<compile_context>
chip_gen: v6e
topology: v6e:2x2x1
jax: 0.10.0
libtpu: 0.0.40
codegen_flags: <defaults>
</compile_context>

<pallas_src>
import functools

import jax
import jax.numpy as jnp
from jax import lax
from jax.experimental import pallas as pl
from jax.experimental.pallas import tpu as pltpu


def _round_up(x, m):
    return (x + m - 1) // m * m


def _cdiv(a, b):
    return -(-a // b)


def _vmem_need_bytes(tc, b_blk, dp, hp):
    """Rough per-core VMEM footprint used to cap the time-chunk size."""
    return (2 * tc * b_blk * dp * 2            # double-buffered bf16 x chunk
            + tc * b_blk * 3 * hp * 4          # f32 fused-gate slab scratch
            + 2 * (dp + hp) * 3 * hp * 2 * 2   # W_ih / W_hh (bf16, 2 buffers)
            + 2 * 8 * 3 * hp * 4               # aux block
            + 2 * (b_blk * hp + b_blk * tc) * 4)   # output blocks


# ----------------------------------------------------------------------------
# Pallas kernel: one chunk of Tc GRU timesteps for one batch block + fused
# (activation-free) mlp2(mlp1(.)) scoring head.  Grid = (batch_block, chunk);
# the chunk axis is sequential ("arbitrary"), the hidden state is carried in
# the grid-resident hidden output block.
# ----------------------------------------------------------------------------
def _gru_mlp_kernel(
        x_ref,                 # (Tc*B_blk, D_pad)   bf16, time-major rows
        wi_ref,                # (D_pad, 3*H_pad)    bf16, [W_ir | W_iz | W_in]
        wh_ref,                # (H_pad, 3*H_pad)    bf16, [W_hr | W_hz | W_hn]
        aux_ref,               # (8, 3*H_pad)        f32 biases + fused head
        hidden_ref,            # out (B_blk, H_pad)  f32, resident carry
        scores_ref,            # out (B_blk, Tc)     f32, time on the lane axis
        g_ref,                 # scratch (Tc*B_blk, 3*H_pad) f32 fused gates
        *, t_valid, needs_mask):
    bsz, hdim = hidden_ref.shape
    tc = scores_ref.shape[-1]
    c = pl.program_id(1)

    # Hidden-state carry lives in the (grid-resident) output block.
    @pl.when(c == 0)
    def _():
        hidden_ref[...] = jnp.zeros_like(hidden_ref)

    # Hoisted, gate-fused input projection over the whole chunk:
    #   g = x @ [W_ir|W_iz|W_in] + [b_ir+b_hr | b_iz+b_hz | b_in]
    g_ref[...] = (jnp.dot(x_ref[...], wi_ref[...],
                          preferred_element_type=jnp.float32)
                  + aux_ref[0:1, :])

    wh = wh_ref[...]                                        # (H_pad, 3*H_pad)
    # Hoisted broadcasts (JAX does not CSE broadcast_in_dim inside loops).
    bh_n = jnp.broadcast_to(aux_ref[1:2, 0:hdim], (bsz, hdim))
    w_eff = jnp.broadcast_to(aux_ref[2:3, 0:hdim], (bsz, hdim))
    lane_t = lax.broadcasted_iota(jnp.int32, (1, tc), 1)    # time lane index

    def step(t, carry):
        h_prev, s_acc = carry
        row = pl.multiple_of(t * bsz, bsz)
        g = g_ref[pl.ds(row, bsz), :]                        # (B, 3H) f32
        # Single fused recurrent matmul (bf16 operands, f32 accumulate).
        gh = jnp.dot(h_prev.astype(jnp.bfloat16), wh,
                     preferred_element_type=jnp.float32)     # (B, 3H)
        # PyTorch GRU gate order (r, z, n); elementwise math stays f32.
        r = jax.nn.sigmoid(g[:, 0:hdim] + gh[:, 0:hdim])
        z = jax.nn.sigmoid(g[:, hdim:2 * hdim] + gh[:, hdim:2 * hdim])
        n = jnp.tanh(g[:, 2 * hdim:] + r * (gh[:, 2 * hdim:] + bh_n))
        h_new = (1.0 - z) * n + z * h_prev
        if needs_mask:                     # static: emitted only if T padded
            h_new = jnp.where(c * tc + t < t_valid, h_new, h_prev)
        # Fused mlp2(mlp1(.)) head, accumulated lane-dense (time on lanes),
        # off the recurrence's critical path (VPU/XLU only).
        s_col = jnp.sum(h_new * w_eff, axis=-1, keepdims=True)   # (B, 1)
        s_acc = s_acc + jnp.where(lane_t == t, s_col, 0.0)       # (B, Tc)
        return h_new, s_acc

    h0 = hidden_ref[...]
    s0 = jnp.zeros((bsz, tc), jnp.float32)
    h_last, s_bt = lax.fori_loop(0, tc, step, (h0, s0),
                                 unroll=True if tc <= 16 else 4)
    hidden_ref[...] = h_last
    scores_ref[...] = s_bt + aux_ref[3:4, 0:1]          # + fused head bias


# ----------------------------------------------------------------------------
# Parameter preparation: PyTorch layout -> padded, gate-fused kernel layout.
# ----------------------------------------------------------------------------
def prepare_kernel_params(p):
    H = p["w_hh"].shape[1]
    D = p["w_ih"].shape[1]
    Hp = _round_up(H, 128)
    Dp = _round_up(D, 128)

    def pad2(a, rows, cols):
        return jnp.pad(a, ((0, rows - a.shape[0]), (0, cols - a.shape[1])))

    def gate_fused(w, in_dim, in_pad):
        # w: (3H, in_dim) PyTorch stacked (r, z, n) -> (in_pad, 3*Hp) bf16.
        cols = [pad2(w[g * H:(g + 1) * H, :].T.astype(jnp.float32), in_pad, Hp)
                for g in range(3)]
        return jnp.concatenate(cols, axis=1).astype(jnp.bfloat16)

    wi = gate_fused(p["w_ih"], D, Dp)                        # (Dp, 3Hp)
    wh = gate_fused(p["w_hh"], H, Hp)                        # (Hp, 3Hp)

    bi = p["b_ih"].astype(jnp.float32)
    bh = p["b_hh"].astype(jnp.float32)

    def padv(v):
        return jnp.pad(v, (0, Hp - H))

    b_r = padv(bi[0:H] + bh[0:H])
    b_z = padv(bi[H:2 * H] + bh[H:2 * H])
    bi_n = padv(bi[2 * H:3 * H])
    bh_n = padv(bh[2 * H:3 * H])

    # Exact head fusion: no nonlinearity between mlp1 and mlp2 in the module.
    w_eff = padv((p["w2"] @ p["w1"]).reshape(H).astype(jnp.float32))
    b_eff = (p["w2"] @ p["b1"] + p["b2"]).reshape(()).astype(jnp.float32)

    aux = jnp.zeros((8, 3 * Hp), jnp.float32)
    aux = aux.at[0, :].set(jnp.concatenate([b_r, b_z, bi_n]))
    aux = aux.at[1, 0:Hp].set(bh_n)
    aux = aux.at[2, 0:Hp].set(w_eff)
    aux = aux.at[3, 0].set(b_eff)

    return {"wi": wi, "wh": wh, "aux": aux, "H": H, "Hp": Hp, "D": D, "Dp": Dp}


# ----------------------------------------------------------------------------
# Wrapper
# ----------------------------------------------------------------------------
def encoder_forward(feats, params, *, t_chunk=128, vmem_budget_bytes=20 * 2**20):
    """feats: (B, T, D) f32 -> (hidden (1, B, H), summary_scores (1, B*T))."""
    B, T, D = feats.shape
    kp = prepare_kernel_params(params)
    H, Hp, Dp = kp["H"], kp["Hp"], kp["Dp"]

    # Batch blocking: at most 2 blocks so v7x's two TensorCores both get an
    # independent recurrence; single block (no-op) for small B.
    b_pad0 = _round_up(max(B, 8), 8)
    b_blk = _round_up(_cdiv(b_pad0, 2), 8) if b_pad0 >= 16 else 8
    n_bb = _cdiv(b_pad0, b_blk)
    b_pad = n_bb * b_blk

    # Time chunking: as few / as fat chunks as the VMEM budget allows.
    nc0 = _cdiv(T, max(8, min(t_chunk, T)))
    tc = _round_up(_cdiv(T, nc0), 8)
    while tc > 8 and _vmem_need_bytes(tc, b_blk, Dp, Hp) > vmem_budget_bytes:
        tc -= 8
    nc = _cdiv(T, tc)
    t_pad = nc * tc

    # Layout: (n_bb, nc, Tc*B_blk, Dp); inside a chunk, rows are time-major.
    x = jnp.pad(feats.astype(jnp.float32),
                ((0, b_pad - B), (0, t_pad - T), (0, Dp - D)))
    x = x.reshape(n_bb, b_blk, nc, tc, Dp).transpose(0, 2, 3, 1, 4)
    x = x.reshape(n_bb, nc, tc * b_blk, Dp).astype(jnp.bfloat16)

    kernel = functools.partial(_gru_mlp_kernel, t_valid=T,
                               needs_mask=(t_pad > T))

    grid_spec = pltpu.PrefetchScalarGridSpec(
        num_scalar_prefetch=0,
        grid=(n_bb, nc),
        in_specs=[
            pl.BlockSpec((None, None, tc * b_blk, Dp),
                         lambda b, c: (b, c, 0, 0)),                 # x chunk
            pl.BlockSpec((Dp, 3 * Hp), lambda b, c: (0, 0)),         # fused W_ih
            pl.BlockSpec((Hp, 3 * Hp), lambda b, c: (0, 0)),         # fused W_hh
            pl.BlockSpec((8, 3 * Hp), lambda b, c: (0, 0)),          # aux block
        ],
        out_specs=(
            pl.BlockSpec((None, b_blk, Hp), lambda b, c: (b, 0, 0)),       # hidden
            pl.BlockSpec((None, None, b_blk, tc), lambda b, c: (b, c, 0, 0)),  # scores
        ),
        scratch_shapes=[pltpu.VMEM((tc * b_blk, 3 * Hp), jnp.float32)],
    )

    need = _vmem_need_bytes(tc, b_blk, Dp, Hp)
    hidden_pad, scores_pad = pl.pallas_call(
        kernel,
        out_shape=(
            jax.ShapeDtypeStruct((n_bb, b_blk, Hp), jnp.float32),
            jax.ShapeDtypeStruct((n_bb, nc, b_blk, tc), jnp.float32),
        ),
        grid_spec=grid_spec,
        compiler_params=pltpu.CompilerParams(
            dimension_semantics=("parallel", "arbitrary"),
            vmem_limit_bytes=int(min(32 * 2**20, max(16 * 2**20, 2 * need))),
        ),
    )(x, kp["wi"], kp["wh"], kp["aux"])

    # PyTorch: hidden has shape (num_layers=1, B, H).
    hidden = hidden_pad.reshape(b_pad, Hp)[:B, :H][None]
    # PyTorch: summary_scores = scores.view(-1, 1).T -> (1, B*T), index b*T+t.
    scores = scores_pad.transpose(0, 2, 1, 3).reshape(b_pad, t_pad)[:B, :T]
    return hidden, scores.reshape(1, B * T)


# ----------------------------------------------------------------------------
# Pure-JAX f32 reference (same math as the PyTorch module) for validation.
# ----------------------------------------------------------------------------
def encoder_forward_reference(feats, params):
    B, T, D = feats.shape
    H = params["w_hh"].shape[1]
    w_ih, w_hh = params["w_ih"], params["w_hh"]
    b_ih, b_hh = params["b_ih"], params["b_hh"]

    def cell(h, x_t):
        gi = x_t @ w_ih.T + b_ih
        gh = h @ w_hh.T + b_hh
        i_r, i_z, i_n = gi[:, :H], gi[:, H:2 * H], gi[:, 2 * H:]
        h_r, h_z, h_n = gh[:, :H], gh[:, H:2 * H], gh[:, 2 * H:]
        r = jax.nn.sigmoid(i_r + h_r)
        z = jax.nn.sigmoid(i_z + h_z)
        n = jnp.tanh(i_n + r * h_n)
        h_new = (1.0 - z) * n + z * h
        return h_new, h_new

    h0 = jnp.zeros((B, H), jnp.float32)
    h_last, outs = lax.scan(cell, h0, jnp.transpose(feats, (1, 0, 2)))
    outputs = jnp.transpose(outs, (1, 0, 2))                 # (B, T, H)
    hid1 = outputs @ params["w1"].T + params["b1"]
    scores = hid1 @ params["w2"].T + params["b2"]            # (B, T, 1)
    return h_last[None], scores.reshape(-1, 1).T


# ----------------------------------------------------------------------------
# Deterministic parameter init (shapes follow EncoderBase.__init__, PyTorch layout)
# ----------------------------------------------------------------------------
def init_params(key, input_dim, hidden_dim):
    ks = jax.random.split(key, 8)
    s = 1.0 / jnp.sqrt(jnp.float32(hidden_dim))

    def u(k, shape):
        return jax.random.uniform(k, shape, minval=-s, maxval=s,
                                  dtype=jnp.float32)

    return {
        # nn.GRU(input_dim, hidden_dim): gate order (r, z, n)
        "w_ih": u(ks[0], (3 * hidden_dim, input_dim)),
        "w_hh": u(ks[1], (3 * hidden_dim, hidden_dim)),
        "b_ih": u(ks[2], (3 * hidden_dim,)),
        "b_hh": u(ks[3], (3 * hidden_dim,)),
        # mlp1: Linear(H, H), mlp2: Linear(H, 1)
        "w1": u(ks[4], (hidden_dim, hidden_dim)),
        "b1": u(ks[5], (hidden_dim,)),
        "w2": u(ks[6], (1, hidden_dim)),
        "b2": u(ks[7], (1,)),
    }


def get_cnn_features(frames, proj):
    # TODO(synk): stand-in for the pretrained GoogLeNet backbone (global
    # avg-pool over spatial dims + fixed deterministic projection to input_dim).
    pooled = frames.mean(axis=(3, 4))                    # (B, T, C)
    return jnp.einsum("btc,cd->btd", pooled, proj)       # (B, T, input_dim)


# ----------------------------------------------------------------------------
if __name__ == "__main__":
    key = jax.random.PRNGKey(0)
    B, T, C, Hs, Ws = 2, 8, 3, 16, 16
    input_dim, hidden_dim = 32, 32

    kx, kp, kproj, kx2 = jax.random.split(key, 4)
    frames = jax.random.normal(kx, (B, T, C, Hs, Ws), dtype=jnp.float32)
    params = init_params(kp, input_dim, hidden_dim)
    proj = 0.1 * jax.random.normal(kproj, (C, input_dim), dtype=jnp.float32)

    feats = get_cnn_features(frames, proj)               # (B, T, input_dim)

    hidden, summary_scores = encoder_forward(feats, params)
    hidden, summary_scores = jax.block_until_ready((hidden, summary_scores))

    assert hidden.shape == (1, B, hidden_dim), hidden.shape
    assert summary_scores.shape == (1, B * T), summary_scores.shape
    assert bool(jnp.all(jnp.isfinite(hidden)))
    assert bool(jnp.all(jnp.isfinite(summary_scores)))

    # Validate against the pure-JAX f32 reference (bf16 MXU operands -> loose tol).
    hidden_want, scores_want = encoder_forward_reference(feats, params)
    err_h = float(jnp.max(jnp.abs(hidden - hidden_want)))
    err_s = float(jnp.max(jnp.abs(summary_scores - scores_want)))
    assert err_h < 2e-2 and err_s < 2e-2, (err_h, err_s)

    # Multi-chunk / padded-time / multi-batch-block path: exercises the
    # cross-chunk hidden carry, the padded-timestep mask and the batch-parallel
    # grid axis (B=10 -> 2 batch blocks, T=20 with Tc=8 -> 3 chunks, 4 padded).
    B2, T2 = 10, 20
    feats2 = 0.5 * jax.random.normal(kx2, (B2, T2, input_dim), dtype=jnp.float32)
    hid2, sc2 = encoder_forward(feats2, params, t_chunk=8)
    hid2, sc2 = jax.block_until_ready((hid2, sc2))
    assert hid2.shape == (1, B2, hidden_dim)
    assert sc2.shape == (1, B2 * T2)
    hid2_want, sc2_want = encoder_forward_reference(feats2, params)
    err_h2 = float(jnp.max(jnp.abs(hid2 - hid2_want)))
    err_s2 = float(jnp.max(jnp.abs(sc2 - sc2_want)))
    # bf16 operand rounding accumulates over T=20 recurrent steps.
    assert err_h2 < 3e-2 and err_s2 < 3e-2, (err_h2, err_s2)

    print("KERNEL_OK")
</pallas_src>

<mosaic_0001>
module attributes {stable_mosaic.version = 11 : i64} {
  func.func @_gru_mlp_kernel(%arg0: i32, %arg1: i32, %arg2: memref<1x1x64x128xbf16, #tpu.memory_space<vmem>>, %arg3: memref<128x384xbf16, #tpu.memory_space<vmem>>, %arg4: memref<128x384xbf16, #tpu.memory_space<vmem>>, %arg5: memref<8x384xf32, #tpu.memory_space<vmem>>, %arg6: memref<1x8x128xf32, #tpu.memory_space<vmem>>, %arg7: memref<1x1x8x8xf32, #tpu.memory_space<vmem>>, %arg8: memref<64x384xf32, #tpu.memory_space<vmem>>) attributes {dimension_semantics = [#tpu.dimension_semantics<parallel>, #tpu.dimension_semantics<arbitrary>], iteration_bounds = array<i64: 1, 1>, scalar_prefetch = 0 : i64, scratch_operands = 1 : i64, tpu.core_type = #tpu.core_type<tc>, window_params = [{transform_indices = @transform_0, window_bounds = array<i64: 1, 1, 64, 128>}, {pipeline_mode = #tpu.pipeline_mode<synchronous>, transform_indices = @transform_1, window_bounds = array<i64: 128, 384>}, {pipeline_mode = #tpu.pipeline_mode<synchronous>, transform_indices = @transform_2, window_bounds = array<i64: 128, 384>}, {pipeline_mode = #tpu.pipeline_mode<synchronous>, transform_indices = @transform_3, window_bounds = array<i64: 8, 384>}, {transform_indices = @transform_4, window_bounds = array<i64: 1, 8, 128>}, {transform_indices = @transform_5, window_bounds = array<i64: 1, 1, 8, 8>}]} {
    %c0_i32 = arith.constant 0 : i32
    %0 = arith.cmpi eq, %arg1, %c0_i32 : i32
    %1 = arith.extui %0 : i1 to i32
    %c0_i32_0 = arith.constant 0 : i32
    %2 = arith.cmpi ne, %1, %c0_i32_0 : i32
    scf.if %2 {
      %cst_91 = arith.constant 0.000000e+00 : f32
      %391 = vector.broadcast %cst_91 : f32 to vector<8x128xf32>
      %c0_92 = arith.constant 0 : index
      %c0_93 = arith.constant 0 : index
      %c0_94 = arith.constant 0 : index
      %392 = vector.load %arg6[%c0_92, %c0_93, %c0_94] : memref<1x8x128xf32, #tpu.memory_space<vmem>>, vector<1x8x128xf32>
      %393 = vector.shape_cast %392 : vector<1x8x128xf32> to vector<8x128xf32>
      %394 = vector.shape_cast %391 : vector<8x128xf32> to vector<1x8x128xf32>
      tpu.vector_store %arg6[%c0_92, %c0_93, %c0_94], %394 {strides = array<i32>} : memref<1x8x128xf32, #tpu.memory_space<vmem>>, vector<1x8x128xf32>,
    } else {
    }
    %c0 = arith.constant 0 : index
    %c0_1 = arith.constant 0 : index
    %c0_2 = arith.constant 0 : index
    %c0_3 = arith.constant 0 : index
    %3 = vector.load %arg2[%c0, %c0_1, %c0_2, %c0_3] : memref<1x1x64x128xbf16, #tpu.memory_space<vmem>>, vector<1x1x64x128xbf16>
    %4 = vector.shape_cast %3 : vector<1x1x64x128xbf16> to vector<64x128xbf16>
    %c0_4 = arith.constant 0 : index
    %c0_5 = arith.constant 0 : index
    %5 = vector.load %arg3[%c0_4, %c0_5] : memref<128x384xbf16, #tpu.memory_space<vmem>>, vector<128x384xbf16>
    %cst = arith.constant dense<0.000000e+00> : vector<64x384xf32>
    %6 = tpu.matmul %4, %5, %cst {dimension_numbers = #tpu.dot_dimension_numbers<[1], [0], [0], [1], [0, 0, 1, 1], [], []>} : vector<64x128xbf16>, vector<128x384xbf16>, vector<64x384xf32> -> vector<64x384xf32>
    %c0_6 = arith.constant 0 : index
    %c0_7 = arith.constant 0 : index
    %7 = vector.load %arg5[%c0_6, %c0_7] : memref<8x384xf32, #tpu.memory_space<vmem>>, vector<1x384xf32>
    %8 = vector.broadcast %7 : vector<1x384xf32> to vector<64x384xf32>
    %9 = arith.addf %6, %8 : vector<64x384xf32>
    %c0_8 = arith.constant 0 : index
    %c0_9 = arith.constant 0 : index
    %10 = vector.load %arg8[%c0_8, %c0_9] : memref<64x384xf32, #tpu.memory_space<vmem>>, vector<64x384xf32>
    tpu.vector_store %arg8[%c0_8, %c0_9], %9 {strides = array<i32>} : memref<64x384xf32, #tpu.memory_space<vmem>>, vector<64x384xf32>,
    %c0_10 = arith.constant 0 : index
    %c0_11 = arith.constant 0 : index
    %11 = vector.load %arg4[%c0_10, %c0_11] : memref<128x384xbf16, #tpu.memory_space<vmem>>, vector<128x384xbf16>
    %c1 = arith.constant 1 : index
    %c0_12 = arith.constant 0 : index
    %12 = vector.load %arg5[%c1, %c0_12] : memref<8x384xf32, #tpu.memory_space<vmem>>, vector<1x128xf32>
    %13 = vector.shape_cast %12 : vector<1x128xf32> to vector<1x128xf32>
    %14 = vector.broadcast %13 : vector<1x128xf32> to vector<8x128xf32>
    %c2 = arith.constant 2 : index
    %c0_13 = arith.constant 0 : index
    %15 = vector.load %arg5[%c2, %c0_13] : memref<8x384xf32, #tpu.memory_space<vmem>>, vector<1x128xf32>
    %16 = vector.shape_cast %15 : vector<1x128xf32> to vector<1x128xf32>
    %17 = vector.broadcast %16 : vector<1x128xf32> to vector<8x128xf32>
    %18 = tpu.iota {dimensions = array<i32: 1>} : vector<1x8xi32>
    %c0_14 = arith.constant 0 : index
    %c0_15 = arith.constant 0 : index
    %c0_16 = arith.constant 0 : index
    %19 = vector.load %arg6[%c0_14, %c0_15, %c0_16] : memref<1x8x128xf32, #tpu.memory_space<vmem>>, vector<1x8x128xf32>
    %20 = vector.shape_cast %19 : vector<1x8x128xf32> to vector<8x128xf32>
    %cst_17 = arith.constant 0.000000e+00 : f32
    %21 = vector.broadcast %cst_17 : f32 to vector<8x8xf32>
    %c0_i32_18 = arith.constant 0 : i32
    %c8_i32 = arith.constant 8 : i32
    %22 = arith.muli %c0_i32_18, %c8_i32 : i32
    %23 = tpu.assume_multiple %22, 8 : i32
    %24 = arith.index_cast %23 : i32 to index
    %c0_19 = arith.constant 0 : index
    %25 = vector.load %arg8[%24, %c0_19] : memref<64x384xf32, #tpu.memory_space<vmem>>, vector<8x384xf32>
    %26 = arith.truncf %20 : vector<8x128xf32> to vector<8x128xbf16>
    %cst_20 = arith.constant dense<0.000000e+00> : vector<8x384xf32>
    %27 = tpu.matmul %26, %11, %cst_20 {dimension_numbers = #tpu.dot_dimension_numbers<[1], [0], [0], [1], [0, 0, 1, 1], [], []>} : vector<8x128xbf16>, vector<128x384xbf16>, vector<8x384xf32> -> vector<8x384xf32>
    %28 = vector.extract_strided_slice %25 {offsets = [0, 0], sizes = [8, 128], strides = [1, 1]} : vector<8x384xf32> to vector<8x128xf32>
    %29 = vector.extract_strided_slice %27 {offsets = [0, 0], sizes = [8, 128], strides = [1, 1]} : vector<8x384xf32> to vector<8x128xf32>
    %30 = arith.addf %28, %29 : vector<8x128xf32>
    %31 = arith.negf %30 : vector<8x128xf32>
    %32 = math.exp %31 : vector<8x128xf32>
    %cst_21 = arith.constant 1.000000e+00 : f32
    %33 = vector.broadcast %cst_21 : f32 to vector<8x128xf32>
    %34 = arith.addf %33, %32 : vector<8x128xf32>
    %35 = arith.divf %33, %34 : vector<8x128xf32>
    %36 = vector.extract_strided_slice %25 {offsets = [0, 128], sizes = [8, 128], strides = [1, 1]} : vector<8x384xf32> to vector<8x128xf32>
    %37 = vector.extract_strided_slice %27 {offsets = [0, 128], sizes = [8, 128], strides = [1, 1]} : vector<8x384xf32> to vector<8x128xf32>
    %38 = arith.addf %36, %37 : vector<8x128xf32>
    %39 = arith.negf %38 : vector<8x128xf32>
    %40 = math.exp %39 : vector<8x128xf32>
    %cst_22 = arith.constant 1.000000e+00 : f32
    %41 = vector.broadcast %cst_22 : f32 to vector<8x128xf32>
    %42 = arith.addf %41, %40 : vector<8x128xf32>
    %43 = arith.divf %41, %42 : vector<8x128xf32>
    %44 = vector.extract_strided_slice %25 {offsets = [0, 256], sizes = [8, 128], strides = [1, 1]} : vector<8x384xf32> to vector<8x128xf32>
    %45 = vector.extract_strided_slice %27 {offsets = [0, 256], sizes = [8, 128], strides = [1, 1]} : vector<8x384xf32> to vector<8x128xf32>
    %46 = arith.addf %45, %14 : vector<8x128xf32>
    %47 = arith.mulf %35, %46 : vector<8x128xf32>
    %48 = arith.addf %44, %47 : vector<8x128xf32>
    %49 = math.tanh %48 : vector<8x128xf32>
    %cst_23 = arith.constant 1.000000e+00 : f32
    %50 = vector.broadcast %cst_23 : f32 to vector<8x128xf32>
    %51 = arith.subf %50, %43 : vector<8x128xf32>
    %52 = arith.mulf %51, %49 : vector<8x128xf32>
    %53 = arith.mulf %43, %20 : vector<8x128xf32>
    %54 = arith.addf %52, %53 : vector<8x128xf32>
    %55 = arith.mulf %54, %17 : vector<8x128xf32>
    %cst_24 = arith.constant dense<0.000000e+00> : vector<8xf32>
    %56 = vector.multi_reduction <add>, %55, %cst_24 [1] : vector<8x128xf32> to vector<8xf32>
    %57 = vector.shape_cast %56 : vector<8xf32> to vector<8x1xf32>
    %58 = vector.broadcast %c0_i32_18 : i32 to vector<1x8xi32>
    %59 = arith.cmpi eq, %18, %58 : vector<1x8xi32>
    %cst_25 = arith.constant 0.000000e+00 : f32
    %60 = vector.shape_cast %59 : vector<1x8xi1> to vector<1x8xi1>
    %61 = vector.broadcast %60 : vector<1x8xi1> to vector<8x8xi1>
    %62 = vector.shape_cast %57 : vector<8x1xf32> to vector<8x1xf32>
    %63 = vector.broadcast %62 : vector<8x1xf32> to vector<8x8xf32>
    %64 = vector.broadcast %cst_25 : f32 to vector<8x8xf32>
    %65 = arith.select %61, %63, %64 : vector<8x8xi1>, vector<8x8xf32>
    %66 = arith.addf %21, %65 : vector<8x8xf32>
    %c1_i32 = arith.constant 1 : i32
    %c8_i32_26 = arith.constant 8 : i32
    %67 = arith.muli %c1_i32, %c8_i32_26 : i32
    %68 = tpu.assume_multiple %67, 8 : i32
    %69 = arith.index_cast %68 : i32 to index
    %c0_27 = arith.constant 0 : index
    %70 = vector.load %arg8[%69, %c0_27] : memref<64x384xf32, #tpu.memory_space<vmem>>, vector<8x384xf32>
    %71 = arith.truncf %54 : vector<8x128xf32> to vector<8x128xbf16>
    %cst_28 = arith.constant dense<0.000000e+00> : vector<8x384xf32>
    %72 = tpu.matmul %71, %11, %cst_28 {dimension_numbers = #tpu.dot_dimension_numbers<[1], [0], [0], [1], [0, 0, 1, 1], [], []>} : vector<8x128xbf16>, vector<128x384xbf16>, vector<8x384xf32> -> vector<8x384xf32>
    %73 = vector.extract_strided_slice %70 {offsets = [0, 0], sizes = [8, 128], strides = [1, 1]} : vector<8x384xf32> to vector<8x128xf32>
    %74 = vector.extract_strided_slice %72 {offsets = [0, 0], sizes = [8, 128], strides = [1, 1]} : vector<8x384xf32> to vector<8x128xf32>
    %75 = arith.addf %73, %74 : vector<8x128xf32>
    %76 = arith.negf %75 : vector<8x128xf32>
    %77 = math.exp %76 : vector<8x128xf32>
    %cst_29 = arith.constant 1.000000e+00 : f32
    %78 = vector.broadcast %cst_29 : f32 to vector<8x128xf32>
    %79 = arith.addf %78, %77 : vector<8x128xf32>
    %80 = arith.divf %78, %79 : vector<8x128xf32>
    %81 = vector.extract_strided_slice %70 {offsets = [0, 128], sizes = [8, 128], strides = [1, 1]} : vector<8x384xf32> to vector<8x128xf32>
    %82 = vector.extract_strided_slice %72 {offsets = [0, 128], sizes = [8, 128], strides = [1, 1]} : vector<8x384xf32> to vector<8x128xf32>
    %83 = arith.addf %81, %82 : vector<8x128xf32>
    %84 = arith.negf %83 : vector<8x128xf32>
    %85 = math.exp %84 : vector<8x128xf32>
    %cst_30 = arith.constant 1.000000e+00 : f32
    %86 = vector.broadcast %cst_30 : f32 to vector<8x128xf32>
    %87 = arith.addf %86, %85 : vector<8x128xf32>
    %88 = arith.divf %86, %87 : vector<8x128xf32>
    %89 = vector.extract_strided_slice %70 {offsets = [0, 256], sizes = [8, 128], strides = [1, 1]} : vector<8x384xf32> to vector<8x128xf32>
    %90 = vector.extract_strided_slice %72 {offsets = [0, 256], sizes = [8, 128], strides = [1, 1]} : vector<8x384xf32> to vector<8x128xf32>
    %91 = arith.addf %90, %14 : vector<8x128xf32>
    %92 = arith.mulf %80, %91 : vector<8x128xf32>
    %93 = arith.addf %89, %92 : vector<8x128xf32>
    %94 = math.tanh %93 : vector<8x128xf32>
    %cst_31 = arith.constant 1.000000e+00 : f32
    %95 = vector.broadcast %cst_31 : f32 to vector<8x128xf32>
    %96 = arith.subf %95, %88 : vector<8x128xf32>
    %97 = arith.mulf %96, %94 : vector<8x128xf32>
    %98 = arith.mulf %88, %54 : vector<8x128xf32>
    %99 = arith.addf %97, %98 : vector<8x128xf32>
    %100 = arith.mulf %99, %17 : vector<8x128xf32>
    %cst_32 = arith.constant dense<0.000000e+00> : vector<8xf32>
    %101 = vector.multi_reduction <add>, %100, %cst_32 [1] : vector<8x128xf32> to vector<8xf32>
    %102 = vector.shape_cast %101 : vector<8xf32> to vector<8x1xf32>
    %103 = vector.broadcast %c1_i32 : i32 to vector<1x8xi32>
    %104 = arith.cmpi eq, %18, %103 : vector<1x8xi32>
    %cst_33 = arith.constant 0.000000e+00 : f32
    %105 = vector.shape_cast %104 : vector<1x8xi1> to vector<1x8xi1>
    %106 = vector.broadcast %105 : vector<1x8xi1> to vector<8x8xi1>
    %107 = vector.shape_cast %102 : vector<8x1xf32> to vector<8x1xf32>
    %108 = vector.broadcast %107 : vector<8x1xf32> to vector<8x8xf32>
    %109 = vector.broadcast %cst_33 : f32 to vector<8x8xf32>
    %110 = arith.select %106, %108, %109 : vector<8x8xi1>, vector<8x8xf32>
    %111 = arith.addf %66, %110 : vector<8x8xf32>
    %c2_i32 = arith.constant 2 : i32
    %c8_i32_34 = arith.constant 8 : i32
    %112 = arith.muli %c2_i32, %c8_i32_34 : i32
    %113 = tpu.assume_multiple %112, 8 : i32
    %114 = arith.index_cast %113 : i32 to index
    %c0_35 = arith.constant 0 : index
    %115 = vector.load %arg8[%114, %c0_35] : memref<64x384xf32, #tpu.memory_space<vmem>>, vector<8x384xf32>
    %116 = arith.truncf %99 : vector<8x128xf32> to vector<8x128xbf16>
    %cst_36 = arith.constant dense<0.000000e+00> : vector<8x384xf32>
    %117 = tpu.matmul %116, %11, %cst_36 {dimension_numbers = #tpu.dot_dimension_numbers<[1], [0], [0], [1], [0, 0, 1, 1], [], []>} : vector<8x128xbf16>, vector<128x384xbf16>, vector<8x384xf32> -> vector<8x384xf32>
    %118 = vector.extract_strided_slice %115 {offsets = [0, 0], sizes = [8, 128], strides = [1, 1]} : vector<8x384xf32> to vector<8x128xf32>
    %119 = vector.extract_strided_slice %117 {offsets = [0, 0], sizes = [8, 128], strides = [1, 1]} : vector<8x384xf32> to vector<8x128xf32>
    %120 = arith.addf %118, %119 : vector<8x128xf32>
    %121 = arith.negf %120 : vector<8x128xf32>
    %122 = math.exp %121 : vector<8x128xf32>
    %cst_37 = arith.constant 1.000000e+00 : f32
    %123 = vector.broadcast %cst_37 : f32 to vector<8x128xf32>
    %124 = arith.addf %123, %122 : vector<8x128xf32>
    %125 = arith.divf %123, %124 : vector<8x128xf32>
    %126 = vector.extract_strided_slice %115 {offsets = [0, 128], sizes = [8, 128], strides = [1, 1]} : vector<8x384xf32> to vector<8x128xf32>
    %127 = vector.extract_strided_slice %117 {offsets = [0, 128], sizes = [8, 128], strides = [1, 1]} : vector<8x384xf32> to vector<8x128xf32>
    %128 = arith.addf %126, %127 : vector<8x128xf32>
    %129 = arith.negf %128 : vector<8x128xf32>
    %130 = math.exp %129 : vector<8x128xf32>
    %cst_38 = arith.constant 1.000000e+00 : f32
    %131 = vector.broadcast %cst_38 : f32 to vector<8x128xf32>
    %132 = arith.addf %131, %130 : vector<8x128xf32>
    %133 = arith.divf %131, %132 : vector<8x128xf32>
    %134 = vector.extract_strided_slice %115 {offsets = [0, 256], sizes = [8, 128], strides = [1, 1]} : vector<8x384xf32> to vector<8x128xf32>
    %135 = vector.extract_strided_slice %117 {offsets = [0, 256], sizes = [8, 128], strides = [1, 1]} : vector<8x384xf32> to vector<8x128xf32>
    %136 = arith.addf %135, %14 : vector<8x128xf32>
    %137 = arith.mulf %125, %136 : vector<8x128xf32>
    %138 = arith.addf %134, %137 : vector<8x128xf32>
    %139 = math.tanh %138 : vector<8x128xf32>
    %cst_39 = arith.constant 1.000000e+00 : f32
    %140 = vector.broadcast %cst_39 : f32 to vector<8x128xf32>
    %141 = arith.subf %140, %133 : vector<8x128xf32>
    %142 = arith.mulf %141, %139 : vector<8x128xf32>
    %143 = arith.mulf %133, %99 : vector<8x128xf32>
    %144 = arith.addf %142, %143 : vector<8x128xf32>
    %145 = arith.mulf %144, %17 : vector<8x128xf32>
    %cst_40 = arith.constant dense<0.000000e+00> : vector<8xf32>
    %146 = vector.multi_reduction <add>, %145, %cst_40 [1] : vector<8x128xf32> to vector<8xf32>
    %147 = vector.shape_cast %146 : vector<8xf32> to vector<8x1xf32>
    %148 = vector.broadcast %c2_i32 : i32 to vector<1x8xi32>
    %149 = arith.cmpi eq, %18, %148 : vector<1x8xi32>
    %cst_41 = arith.constant 0.000000e+00 : f32
    %150 = vector.shape_cast %149 : vector<1x8xi1> to vector<1x8xi1>
    %151 = vector.broadcast %150 : vector<1x8xi1> to vector<8x8xi1>
    %152 = vector.shape_cast %147 : vector<8x1xf32> to vector<8x1xf32>
    %153 = vector.broadcast %152 : vector<8x1xf32> to vector<8x8xf32>
    %154 = vector.broadcast %cst_41 : f32 to vector<8x8xf32>
    %155 = arith.select %151, %153, %154 : vector<8x8xi1>, vector<8x8xf32>
    %156 = arith.addf %111, %155 : vector<8x8xf32>
    %c3_i32 = arith.constant 3 : i32
    %c8_i32_42 = arith.constant 8 : i32
    %157 = arith.muli %c3_i32, %c8_i32_42 : i32
    %158 = tpu.assume_multiple %157, 8 : i32
    %159 = arith.index_cast %158 : i32 to index
    %c0_43 = arith.constant 0 : index
    %160 = vector.load %arg8[%159, %c0_43] : memref<64x384xf32, #tpu.memory_space<vmem>>, vector<8x384xf32>
    %161 = arith.truncf %144 : vector<8x128xf32> to vector<8x128xbf16>
    %cst_44 = arith.constant dense<0.000000e+00> : vector<8x384xf32>
    %162 = tpu.matmul %161, %11, %cst_44 {dimension_numbers = #tpu.dot_dimension_numbers<[1], [0], [0], [1], [0, 0, 1, 1], [], []>} : vector<8x128xbf16>, vector<128x384xbf16>, vector<8x384xf32> -> vector<8x384xf32>
    %163 = vector.extract_strided_slice %160 {offsets = [0, 0], sizes = [8, 128], strides = [1, 1]} : vector<8x384xf32> to vector<8x128xf32>
    %164 = vector.extract_strided_slice %162 {offsets = [0, 0], sizes = [8, 128], strides = [1, 1]} : vector<8x384xf32> to vector<8x128xf32>
    %165 = arith.addf %163, %164 : vector<8x128xf32>
    %166 = arith.negf %165 : vector<8x128xf32>
    %167 = math.exp %166 : vector<8x128xf32>
    %cst_45 = arith.constant 1.000000e+00 : f32
    %168 = vector.broadcast %cst_45 : f32 to vector<8x128xf32>
    %169 = arith.addf %168, %167 : vector<8x128xf32>
    %170 = arith.divf %168, %169 : vector<8x128xf32>
    %171 = vector.extract_strided_slice %160 {offsets = [0, 128], sizes = [8, 128], strides = [1, 1]} : vector<8x384xf32> to vector<8x128xf32>
    %172 = vector.extract_strided_slice %162 {offsets = [0, 128], sizes = [8, 128], strides = [1, 1]} : vector<8x384xf32> to vector<8x128xf32>
    %173 = arith.addf %171, %172 : vector<8x128xf32>
    %174 = arith.negf %173 : vector<8x128xf32>
    %175 = math.exp %174 : vector<8x128xf32>
    %cst_46 = arith.constant 1.000000e+00 : f32
    %176 = vector.broadcast %cst_46 : f32 to vector<8x128xf32>
    %177 = arith.addf %176, %175 : vector<8x128xf32>
    %178 = arith.divf %176, %177 : vector<8x128xf32>
    %179 = vector.extract_strided_slice %160 {offsets = [0, 256], sizes = [8, 128], strides = [1, 1]} : vector<8x384xf32> to vector<8x128xf32>
    %180 = vector.extract_strided_slice %162 {offsets = [0, 256], sizes = [8, 128], strides = [1, 1]} : vector<8x384xf32> to vector<8x128xf32>
    %181 = arith.addf %180, %14 : vector<8x128xf32>
    %182 = arith.mulf %170, %181 : vector<8x128xf32>
    %183 = arith.addf %179, %182 : vector<8x128xf32>
    %184 = math.tanh %183 : vector<8x128xf32>
    %cst_47 = arith.constant 1.000000e+00 : f32
    %185 = vector.broadcast %cst_47 : f32 to vector<8x128xf32>
    %186 = arith.subf %185, %178 : vector<8x128xf32>
    %187 = arith.mulf %186, %184 : vector<8x128xf32>
    %188 = arith.mulf %178, %144 : vector<8x128xf32>
    %189 = arith.addf %187, %188 : vector<8x128xf32>
    %190 = arith.mulf %189, %17 : vector<8x128xf32>
    %cst_48 = arith.constant dense<0.000000e+00> : vector<8xf32>
    %191 = vector.multi_reduction <add>, %190, %cst_48 [1] : vector<8x128xf32> to vector<8xf32>
    %192 = vector.shape_cast %191 : vector<8xf32> to vector<8x1xf32>
    %193 = vector.broadcast %c3_i32 : i32 to vector<1x8xi32>
    %194 = arith.cmpi eq, %18, %193 : vector<1x8xi32>
    %cst_49 = arith.constant 0.000000e+00 : f32
    %195 = vector.shape_cast %194 : vector<1x8xi1> to vector<1x8xi1>
    %196 = vector.broadcast %195 : vector<1x8xi1> to vector<8x8xi1>
    %197 = vector.shape_cast %192 : vector<8x1xf32> to vector<8x1xf32>
    %198 = vector.broadcast %197 : vector<8x1xf32> to vector<8x8xf32>
    %199 = vector.broadcast %cst_49 : f32 to vector<8x8xf32>
    %200 = arith.select %196, %198, %199 : vector<8x8xi1>, vector<8x8xf32>
    %201 = arith.addf %156, %200 : vector<8x8xf32>
    %c4_i32 = arith.constant 4 : i32
    %c8_i32_50 = arith.constant 8 : i32
    %202 = arith.muli %c4_i32, %c8_i32_50 : i32
    %203 = tpu.assume_multiple %202, 8 : i32
    %204 = arith.index_cast %203 : i32 to index
    %c0_51 = arith.constant 0 : index
    %205 = vector.load %arg8[%204, %c0_51] : memref<64x384xf32, #tpu.memory_space<vmem>>, vector<8x384xf32>
    %206 = arith.truncf %189 : vector<8x128xf32> to vector<8x128xbf16>
    %cst_52 = arith.constant dense<0.000000e+00> : vector<8x384xf32>
    %207 = tpu.matmul %206, %11, %cst_52 {dimension_numbers = #tpu.dot_dimension_numbers<[1], [0], [0], [1], [0, 0, 1, 1], [], []>} : vector<8x128xbf16>, vector<128x384xbf16>, vector<8x384xf32> -> vector<8x384xf32>
    %208 = vector.extract_strided_slice %205 {offsets = [0, 0], sizes = [8, 128], strides = [1, 1]} : vector<8x384xf32> to vector<8x128xf32>
    %209 = vector.extract_strided_slice %207 {offsets = [0, 0], sizes = [8, 128], strides = [1, 1]} : vector<8x384xf32> to vector<8x128xf32>
    %210 = arith.addf %208, %209 : vector<8x128xf32>
    %211 = arith.negf %210 : vector<8x128xf32>
    %212 = math.exp %211 : vector<8x128xf32>
    %cst_53 = arith.constant 1.000000e+00 : f32
    %213 = vector.broadcast %cst_53 : f32 to vector<8x128xf32>
    %214 = arith.addf %213, %212 : vector<8x128xf32>
    %215 = arith.divf %213, %214 : vector<8x128xf32>
    %216 = vector.extract_strided_slice %205 {offsets = [0, 128], sizes = [8, 128], strides = [1, 1]} : vector<8x384xf32> to vector<8x128xf32>
    %217 = vector.extract_strided_slice %207 {offsets = [0, 128], sizes = [8, 128], strides = [1, 1]} : vector<8x384xf32> to vector<8x128xf32>
    %218 = arith.addf %216, %217 : vector<8x128xf32>
    %219 = arith.negf %218 : vector<8x128xf32>
    %220 = math.exp %219 : vector<8x128xf32>
    %cst_54 = arith.constant 1.000000e+00 : f32
    %221 = vector.broadcast %cst_54 : f32 to vector<8x128xf32>
    %222 = arith.addf %221, %220 : vector<8x128xf32>
    %223 = arith.divf %221, %222 : vector<8x128xf32>
    %224 = vector.extract_strided_slice %205 {offsets = [0, 256], sizes = [8, 128], strides = [1, 1]} : vector<8x384xf32> to vector<8x128xf32>
    %225 = vector.extract_strided_slice %207 {offsets = [0, 256], sizes = [8, 128], strides = [1, 1]} : vector<8x384xf32> to vector<8x128xf32>
    %226 = arith.addf %225, %14 : vector<8x128xf32>
    %227 = arith.mulf %215, %226 : vector<8x128xf32>
    %228 = arith.addf %224, %227 : vector<8x128xf32>
    %229 = math.tanh %228 : vector<8x128xf32>
    %cst_55 = arith.constant 1.000000e+00 : f32
    %230 = vector.broadcast %cst_55 : f32 to vector<8x128xf32>
    %231 = arith.subf %230, %223 : vector<8x128xf32>
    %232 = arith.mulf %231, %229 : vector<8x128xf32>
    %233 = arith.mulf %223, %189 : vector<8x128xf32>
    %234 = arith.addf %232, %233 : vector<8x128xf32>
    %235 = arith.mulf %234, %17 : vector<8x128xf32>
    %cst_56 = arith.constant dense<0.000000e+00> : vector<8xf32>
    %236 = vector.multi_reduction <add>, %235, %cst_56 [1] : vector<8x128xf32> to vector<8xf32>
    %237 = vector.shape_cast %236 : vector<8xf32> to vector<8x1xf32>
    %238 = vector.broadcast %c4_i32 : i32 to vector<1x8xi32>
    %239 = arith.cmpi eq, %18, %238 : vector<1x8xi32>
    %cst_57 = arith.constant 0.000000e+00 : f32
    %240 = vector.shape_cast %239 : vector<1x8xi1> to vector<1x8xi1>
    %241 = vector.broadcast %240 : vector<1x8xi1> to vector<8x8xi1>
    %242 = vector.shape_cast %237 : vector<8x1xf32> to vector<8x1xf32>
    %243 = vector.broadcast %242 : vector<8x1xf32> to vector<8x8xf32>
    %244 = vector.broadcast %cst_57 : f32 to vector<8x8xf32>
    %245 = arith.select %241, %243, %244 : vector<8x8xi1>, vector<8x8xf32>
    %246 = arith.addf %201, %245 : vector<8x8xf32>
    %c5_i32 = arith.constant 5 : i32
    %c8_i32_58 = arith.constant 8 : i32
    %247 = arith.muli %c5_i32, %c8_i32_58 : i32
    %248 = tpu.assume_multiple %247, 8 : i32
    %249 = arith.index_cast %248 : i32 to index
    %c0_59 = arith.constant 0 : index
    %250 = vector.load %arg8[%249, %c0_59] : memref<64x384xf32, #tpu.memory_space<vmem>>, vector<8x384xf32>
    %251 = arith.truncf %234 : vector<8x128xf32> to vector<8x128xbf16>
    %cst_60 = arith.constant dense<0.000000e+00> : vector<8x384xf32>
    %252 = tpu.matmul %251, %11, %cst_60 {dimension_numbers = #tpu.dot_dimension_numbers<[1], [0], [0], [1], [0, 0, 1, 1], [], []>} : vector<8x128xbf16>, vector<128x384xbf16>, vector<8x384xf32> -> vector<8x384xf32>
    %253 = vector.extract_strided_slice %250 {offsets = [0, 0], sizes = [8, 128], strides = [1, 1]} : vector<8x384xf32> to vector<8x128xf32>
    %254 = vector.extract_strided_slice %252 {offsets = [0, 0], sizes = [8, 128], strides = [1, 1]} : vector<8x384xf32> to vector<8x128xf32>
    %255 = arith.addf %253, %254 : vector<8x128xf32>
    %256 = arith.negf %255 : vector<8x128xf32>
    %257 = math.exp %256 : vector<8x128xf32>
    %cst_61 = arith.constant 1.000000e+00 : f32
    %258 = vector.broadcast %cst_61 : f32 to vector<8x128xf32>
    %259 = arith.addf %258, %257 : vector<8x128xf32>
    %260 = arith.divf %258, %259 : vector<8x128xf32>
    %261 = vector.extract_strided_slice %250 {offsets = [0, 128], sizes = [8, 128], strides = [1, 1]} : vector<8x384xf32> to vector<8x128xf32>
    %262 = vector.extract_strided_slice %252 {offsets = [0, 128], sizes = [8, 128], strides = [1, 1]} : vector<8x384xf32> to vector<8x128xf32>
    %263 = arith.addf %261, %262 : vector<8x128xf32>
    %264 = arith.negf %263 : vector<8x128xf32>
    %265 = math.exp %264 : vector<8x128xf32>
    %cst_62 = arith.constant 1.000000e+00 : f32
    %266 = vector.broadcast %cst_62 : f32 to vector<8x128xf32>
    %267 = arith.addf %266, %265 : vector<8x128xf32>
    %268 = arith.divf %266, %267 : vector<8x128xf32>
    %269 = vector.extract_strided_slice %250 {offsets = [0, 256], sizes = [8, 128], strides = [1, 1]} : vector<8x384xf32> to vector<8x128xf32>
    %270 = vector.extract_strided_slice %252 {offsets = [0, 256], sizes = [8, 128], strides = [1, 1]} : vector<8x384xf32> to vector<8x128xf32>
    %271 = arith.addf %270, %14 : vector<8x128xf32>
    %272 = arith.mulf %260, %271 : vector<8x128xf32>
    %273 = arith.addf %269, %272 : vector<8x128xf32>
    %274 = math.tanh %273 : vector<8x128xf32>
    %cst_63 = arith.constant 1.000000e+00 : f32
    %275 = vector.broadcast %cst_63 : f32 to vector<8x128xf32>
    %276 = arith.subf %275, %268 : vector<8x128xf32>
    %277 = arith.mulf %276, %274 : vector<8x128xf32>
    %278 = arith.mulf %268, %234 : vector<8x128xf32>
    %279 = arith.addf %277, %278 : vector<8x128xf32>
    %280 = arith.mulf %279, %17 : vector<8x128xf32>
    %cst_64 = arith.constant dense<0.000000e+00> : vector<8xf32>
    %281 = vector.multi_reduction <add>, %280, %cst_64 [1] : vector<8x128xf32> to vector<8xf32>
    %282 = vector.shape_cast %281 : vector<8xf32> to vector<8x1xf32>
    %283 = vector.broadcast %c5_i32 : i32 to vector<1x8xi32>
    %284 = arith.cmpi eq, %18, %283 : vector<1x8xi32>
    %cst_65 = arith.constant 0.000000e+00 : f32
    %285 = vector.shape_cast %284 : vector<1x8xi1> to vector<1x8xi1>
    %286 = vector.broadcast %285 : vector<1x8xi1> to vector<8x8xi1>
    %287 = vector.shape_cast %282 : vector<8x1xf32> to vector<8x1xf32>
    %288 = vector.broadcast %287 : vector<8x1xf32> to vector<8x8xf32>
    %289 = vector.broadcast %cst_65 : f32 to vector<8x8xf32>
    %290 = arith.select %286, %288, %289 : vector<8x8xi1>, vector<8x8xf32>
    %291 = arith.addf %246, %290 : vector<8x8xf32>
    %c6_i32 = arith.constant 6 : i32
    %c8_i32_66 = arith.constant 8 : i32
    %292 = arith.muli %c6_i32, %c8_i32_66 : i32
    %293 = tpu.assume_multiple %292, 8 : i32
    %294 = arith.index_cast %293 : i32 to index
    %c0_67 = arith.constant 0 : index
    %295 = vector.load %arg8[%294, %c0_67] : memref<64x384xf32, #tpu.memory_space<vmem>>, vector<8x384xf32>
    %296 = arith.truncf %279 : vector<8x128xf32> to vector<8x128xbf16>
    %cst_68 = arith.constant dense<0.000000e+00> : vector<8x384xf32>
    %297 = tpu.matmul %296, %11, %cst_68 {dimension_numbers = #tpu.dot_dimension_numbers<[1], [0], [0], [1], [0, 0, 1, 1], [], []>} : vector<8x128xbf16>, vector<128x384xbf16>, vector<8x384xf32> -> vector<8x384xf32>
    %298 = vector.extract_strided_slice %295 {offsets = [0, 0], sizes = [8, 128], strides = [1, 1]} : vector<8x384xf32> to vector<8x128xf32>
    %299 = vector.extract_strided_slice %297 {offsets = [0, 0], sizes = [8, 128], strides = [1, 1]} : vector<8x384xf32> to vector<8x128xf32>
    %300 = arith.addf %298, %299 : vector<8x128xf32>
    %301 = arith.negf %300 : vector<8x128xf32>
    %302 = math.exp %301 : vector<8x128xf32>
    %cst_69 = arith.constant 1.000000e+00 : f32
    %303 = vector.broadcast %cst_69 : f32 to vector<8x128xf32>
    %304 = arith.addf %303, %302 : vector<8x128xf32>
    %305 = arith.divf %303, %304 : vector<8x128xf32>
    %306 = vector.extract_strided_slice %295 {offsets = [0, 128], sizes = [8, 128], strides = [1, 1]} : vector<8x384xf32> to vector<8x128xf32>
    %307 = vector.extract_strided_slice %297 {offsets = [0, 128], sizes = [8, 128], strides = [1, 1]} : vector<8x384xf32> to vector<8x128xf32>
    %308 = arith.addf %306, %307 : vector<8x128xf32>
    %309 = arith.negf %308 : vector<8x128xf32>
    %310 = math.exp %309 : vector<8x128xf32>
    %cst_70 = arith.constant 1.000000e+00 : f32
    %311 = vector.broadcast %cst_70 : f32 to vector<8x128xf32>
    %312 = arith.addf %311, %310 : vector<8x128xf32>
    %313 = arith.divf %311, %312 : vector<8x128xf32>
    %314 = vector.extract_strided_slice %295 {offsets = [0, 256], sizes = [8, 128], strides = [1, 1]} : vector<8x384xf32> to vector<8x128xf32>
    %315 = vector.extract_strided_slice %297 {offsets = [0, 256], sizes = [8, 128], strides = [1, 1]} : vector<8x384xf32> to vector<8x128xf32>
    %316 = arith.addf %315, %14 : vector<8x128xf32>
    %317 = arith.mulf %305, %316 : vector<8x128xf32>
    %318 = arith.addf %314, %317 : vector<8x128xf32>
    %319 = math.tanh %318 : vector<8x128xf32>
    %cst_71 = arith.constant 1.000000e+00 : f32
    %320 = vector.broadcast %cst_71 : f32 to vector<8x128xf32>
    %321 = arith.subf %320, %313 : vector<8x128xf32>
    %322 = arith.mulf %321, %319 : vector<8x128xf32>
    %323 = arith.mulf %313, %279 : vector<8x128xf32>
    %324 = arith.addf %322, %323 : vector<8x128xf32>
    %325 = arith.mulf %324, %17 : vector<8x128xf32>
    %cst_72 = arith.constant dense<0.000000e+00> : vector<8xf32>
    %326 = vector.multi_reduction <add>, %325, %cst_72 [1] : vector<8x128xf32> to vector<8xf32>
    %327 = vector.shape_cast %326 : vector<8xf32> to vector<8x1xf32>
    %328 = vector.broadcast %c6_i32 : i32 to vector<1x8xi32>
    %329 = arith.cmpi eq, %18, %328 : vector<1x8xi32>
    %cst_73 = arith.constant 0.000000e+00 : f32
    %330 = vector.shape_cast %329 : vector<1x8xi1> to vector<1x8xi1>
    %331 = vector.broadcast %330 : vector<1x8xi1> to vector<8x8xi1>
    %332 = vector.shape_cast %327 : vector<8x1xf32> to vector<8x1xf32>
    %333 = vector.broadcast %332 : vector<8x1xf32> to vector<8x8xf32>
    %334 = vector.broadcast %cst_73 : f32 to vector<8x8xf32>
    %335 = arith.select %331, %333, %334 : vector<8x8xi1>, vector<8x8xf32>
    %336 = arith.addf %291, %335 : vector<8x8xf32>
    %c7_i32 = arith.constant 7 : i32
    %c8_i32_74 = arith.constant 8 : i32
    %337 = arith.muli %c7_i32, %c8_i32_74 : i32
    %338 = tpu.assume_multiple %337, 8 : i32
    %339 = arith.index_cast %338 : i32 to index
    %c0_75 = arith.constant 0 : index
    %340 = vector.load %arg8[%339, %c0_75] : memref<64x384xf32, #tpu.memory_space<vmem>>, vector<8x384xf32>
    %341 = arith.truncf %324 : vector<8x128xf32> to vector<8x128xbf16>
    %cst_76 = arith.constant dense<0.000000e+00> : vector<8x384xf32>
    %342 = tpu.matmul %341, %11, %cst_76 {dimension_numbers = #tpu.dot_dimension_numbers<[1], [0], [0], [1], [0, 0, 1, 1], [], []>} : vector<8x128xbf16>, vector<128x384xbf16>, vector<8x384xf32> -> vector<8x384xf32>
    %343 = vector.extract_strided_slice %340 {offsets = [0, 0], sizes = [8, 128], strides = [1, 1]} : vector<8x384xf32> to vector<8x128xf32>
    %344 = vector.extract_strided_slice %342 {offsets = [0, 0], sizes = [8, 128], strides = [1, 1]} : vector<8x384xf32> to vector<8x128xf32>
    %345 = arith.addf %343, %344 : vector<8x128xf32>
    %346 = arith.negf %345 : vector<8x128xf32>
    %347 = math.exp %346 : vector<8x128xf32>
    %cst_77 = arith.constant 1.000000e+00 : f32
    %348 = vector.broadcast %cst_77 : f32 to vector<8x128xf32>
    %349 = arith.addf %348, %347 : vector<8x128xf32>
    %350 = arith.divf %348, %349 : vector<8x128xf32>
    %351 = vector.extract_strided_slice %340 {offsets = [0, 128], sizes = [8, 128], strides = [1, 1]} : vector<8x384xf32> to vector<8x128xf32>
    %352 = vector.extract_strided_slice %342 {offsets = [0, 128], sizes = [8, 128], strides = [1, 1]} : vector<8x384xf32> to vector<8x128xf32>
    %353 = arith.addf %351, %352 : vector<8x128xf32>
    %354 = arith.negf %353 : vector<8x128xf32>
    %355 = math.exp %354 : vector<8x128xf32>
    %cst_78 = arith.constant 1.000000e+00 : f32
    %356 = vector.broadcast %cst_78 : f32 to vector<8x128xf32>
    %357 = arith.addf %356, %355 : vector<8x128xf32>
    %358 = arith.divf %356, %357 : vector<8x128xf32>
    %359 = vector.extract_strided_slice %340 {offsets = [0, 256], sizes = [8, 128], strides = [1, 1]} : vector<8x384xf32> to vector<8x128xf32>
    %360 = vector.extract_strided_slice %342 {offsets = [0, 256], sizes = [8, 128], strides = [1, 1]} : vector<8x384xf32> to vector<8x128xf32>
    %361 = arith.addf %360, %14 : vector<8x128xf32>
    %362 = arith.mulf %350, %361 : vector<8x128xf32>
    %363 = arith.addf %359, %362 : vector<8x128xf32>
    %364 = math.tanh %363 : vector<8x128xf32>
    %cst_79 = arith.constant 1.000000e+00 : f32
    %365 = vector.broadcast %cst_79 : f32 to vector<8x128xf32>
    %366 = arith.subf %365, %358 : vector<8x128xf32>
    %367 = arith.mulf %366, %364 : vector<8x128xf32>
    %368 = arith.mulf %358, %324 : vector<8x128xf32>
    %369 = arith.addf %367, %368 : vector<8x128xf32>
    %370 = arith.mulf %369, %17 : vector<8x128xf32>
    %cst_80 = arith.constant dense<0.000000e+00> : vector<8xf32>
    %371 = vector.multi_reduction <add>, %370, %cst_80 [1] : vector<8x128xf32> to vector<8xf32>
    %372 = vector.shape_cast %371 : vector<8xf32> to vector<8x1xf32>
    %373 = vector.broadcast %c7_i32 : i32 to vector<1x8xi32>
    %374 = arith.cmpi eq, %18, %373 : vector<1x8xi32>
    %cst_81 = arith.constant 0.000000e+00 : f32
    %375 = vector.shape_cast %374 : vector<1x8xi1> to vector<1x8xi1>
    %376 = vector.broadcast %375 : vector<1x8xi1> to vector<8x8xi1>
    %377 = vector.shape_cast %372 : vector<8x1xf32> to vector<8x1xf32>
    %378 = vector.broadcast %377 : vector<8x1xf32> to vector<8x8xf32>
    %379 = vector.broadcast %cst_81 : f32 to vector<8x8xf32>
    %380 = arith.select %376, %378, %379 : vector<8x8xi1>, vector<8x8xf32>
    %381 = arith.addf %336, %380 : vector<8x8xf32>
    %c8_i32_82 = arith.constant 8 : i32
    %c0_83 = arith.constant 0 : index
    %c0_84 = arith.constant 0 : index
    %c0_85 = arith.constant 0 : index
    %382 = vector.load %arg6[%c0_83, %c0_84, %c0_85] : memref<1x8x128xf32, #tpu.memory_space<vmem>>, vector<1x8x128xf32>
    %383 = vector.shape_cast %382 : vector<1x8x128xf32> to vector<8x128xf32>
    %384 = vector.shape_cast %369 : vector<8x128xf32> to vector<1x8x128xf32>
    tpu.vector_store %arg6[%c0_83, %c0_84, %c0_85], %384 {strides = array<i32>} : memref<1x8x128xf32, #tpu.memory_space<vmem>>, vector<1x8x128xf32>,
    %c3 = arith.constant 3 : index
    %c0_86 = arith.constant 0 : index
    %385 = vector.load %arg5[%c3, %c0_86] : memref<8x384xf32, #tpu.memory_space<vmem>>, vector<1x1xf32>
    %386 = vector.broadcast %385 : vector<1x1xf32> to vector<8x8xf32>
    %387 = arith.addf %381, %386 : vector<8x8xf32>
    %c0_87 = arith.constant 0 : index
    %c0_88 = arith.constant 0 : index
    %c0_89 = arith.constant 0 : index
    %c0_90 = arith.constant 0 : index
    %388 = vector.load %arg7[%c0_87, %c0_88, %c0_89, %c0_90] : memref<1x1x8x8xf32, #tpu.memory_space<vmem>>, vector<1x1x8x8xf32>
    %389 = vector.shape_cast %388 : vector<1x1x8x8xf32> to vector<8x8xf32>
    %390 = vector.shape_cast %387 : vector<8x8xf32> to vector<1x1x8x8xf32>
    tpu.vector_store %arg7[%c0_87, %c0_88, %c0_89, %c0_90], %390 {strides = array<i32>} : memref<1x1x8x8xf32, #tpu.memory_space<vmem>>, vector<1x1x8x8xf32>,
    return
  }
  func.func @transform_0(%arg0: i32, %arg1: i32) -> (i32, i32, i32, i32) {
    %c0_i32 = arith.constant 0 : i32
    %c0_i32_0 = arith.constant 0 : i32
    %c0_i32_1 = arith.constant 0 : i32
    return %arg0, %arg1, %c0_i32, %c0_i32_0 : i32, i32, i32, i32
  }
  func.func @transform_1(%arg0: i32, %arg1: i32) -> (i32, i32) {
    %c0_i32 = arith.constant 0 : i32
    %c0_i32_0 = arith.constant 0 : i32
    %c0_i32_1 = arith.constant 0 : i32
    return %c0_i32, %c0_i32_0 : i32, i32
  }
  func.func @transform_2(%arg0: i32, %arg1: i32) -> (i32, i32) {
    %c0_i32 = arith.constant 0 : i32
    %c0_i32_0 = arith.constant 0 : i32
    %c0_i32_1 = arith.constant 0 : i32
    return %c0_i32, %c0_i32_0 : i32, i32
  }
  func.func @transform_3(%arg0: i32, %arg1: i32) -> (i32, i32) {
    %c0_i32 = arith.constant 0 : i32
    %c0_i32_0 = arith.constant 0 : i32
    %c0_i32_1 = arith.constant 0 : i32
    return %c0_i32, %c0_i32_0 : i32, i32
  }
  func.func @transform_4(%arg0: i32, %arg1: i32) -> (i32, i32, i32) {
    %c0_i32 = arith.constant 0 : i32
    %c0_i32_0 = arith.constant 0 : i32
    %c0_i32_1 = arith.constant 0 : i32
    return %arg0, %c0_i32, %c0_i32_0 : i32, i32, i32
  }
  func.func @transform_5(%arg0: i32, %arg1: i32) -> (i32, i32, i32, i32) {
    %c0_i32 = arith.constant 0 : i32
    %c0_i32_0 = arith.constant 0 : i32
    %c0_i32_1 = arith.constant 0 : i32
    return %arg0, %arg1, %c0_i32, %c0_i32_0 : i32, i32, i32, i32
  }
}

</mosaic_0001>

<bundles_post_ra>
// kernel: tpu_custom_call.1
= control target key start
LH: loop header
LB: loop body
LE: loop exit
PB: predicated region body
PF: predicated region fallthrough
CT: control target
= control target key end

     0   :  { %11 = vsyncpa [#allocation4], 0  ;;  %s2768_s0 = inlined_call_operand.hbm [shape: bf16[1,1,64,128], index: 0, kind: input, shape index: {}]   ;;  %s2769_s1 = inlined_call_operand.hbm [shape: bf16[128,384], index: 1, kind: input, shape index: {}]   ;;  %s2770_s2 = inlined_call_operand.hbm [shape: bf16[128,384], index: 2, kind: input, shape index: {}]   ;;  %s2771_s3 = inlined_call_operand.hbm [shape: f32[8,384], index: 3, kind: input, shape index: {}]   ;;  %s2772_s4 = inlined_call_operand.hbm [shape: f32[1,8,128], index: 4, kind: output, shape index: {0}]   ;;  %s2773_s5 = inlined_call_operand.hbm [shape: f32[1,1,8,8], index: 5, kind: output, shape index: {1}]  }
   0x1   :  { %12 = vsyncpa [#allocation7], 0 }
   0x2   :  { %13 = vsyncpa [#allocation10], 0 }
   0x3   :  { %14 = vsyncpa [#allocation5], 0 }
   0x4   :  { %15 = vsyncpa [#allocation13], 0  ;;  %s2260_s18 = smov [#allocation6]  }
   0x5   :  { %s33_s19 = sshll.u32 %s2260_s18, 4  ;;  %s34_s19 = int_to_ptr.vmem [resolvable:$true] %s33_s19 }
   0x6   :  { %s2138_s20 = scalar_lea.vmem %s34_s19, 3072  ;;  %p2143_p1 = scmp.lt.s32.totalorder %s34_s19, %s34_s19 }
   0x7   :  { %p2139_p0 = scmp.ne.s32.totalorder %s34_s19, %s2138_s20  ;;  %p2144_p2 = scmp.lt.s32.totalorder %s2138_s20, %s2138_s20 }
   0x9   :  { %p2145_p3 = por %p2144_p2, %p2143_p1 }
   0xb   :  { %p2146_p4 = pnand %p2145_p3, %p2139_p0 }
   0xd   :  { %2149 = shalt.err (!%p2146_p4)
}
   0xe   :  { %s2261_s21 = smov 192   ;;  %s2262_s22 = smov 12  }
   0xf   :  { %39 = dma.hbm_to_vmem [thread:$0]  %s2769_s1, 3072, %s34_s19, [#allocation7], %s2261_s21, %s2261_s21, %s2262_s22  }
  0x10   :  { %s2263_s25 = smov [#allocation3]  }
  0x11   :  { %s21_s26 = sshll.u32 %s2263_s25, 4  ;;  %s22_s26 = int_to_ptr.vmem [resolvable:$true] %s21_s26 }
  0x12   :  { %s2158_s27 = scalar_lea.vmem %s22_s26, 512  ;;  %p2163_p6 = scmp.lt.s32.totalorder %s22_s26, %s22_s26 }
  0x13   :  { %p2159_p5 = scmp.ne.s32.totalorder %s22_s26, %s2158_s27  ;;  %p2164_p7 = scmp.lt.s32.totalorder %s2158_s27, %s2158_s27 }
  0x15   :  { %p2165_p8 = por %p2164_p7, %p2163_p6 }
  0x17   :  { %p2166_p9 = pnand %p2165_p8, %p2159_p5 }
  0x19   :  { %2169 = shalt.err (!%p2166_p9)
}
  0x1a   :  { %s2264_s28 = smov 64   ;;  %s2265_s29 = smov 4  }
  0x1b   :  { %27 = dma.hbm_to_vmem [thread:$0]  %s2768_s0, 512, %s22_s26, [#allocation4], %s2264_s28, %s2264_s28, %s2265_s29  }
  0x1c   :  { %s2266_s7 = smov [#allocation8]   ;;  %s2267_s9 = smov [#allocation9]  }
  0x1d   :  { %s45_s8 = sshll.u32 %s2266_s7, 4  ;;  %s58_s1 = sshll.u32 %s2267_s9, 4  ;;  %s46_s8 = int_to_ptr.vmem [resolvable:$true] %s45_s8  ;;  %s59_s1 = int_to_ptr.vmem [resolvable:$true] %s58_s1 }
  0x1e   :  { %s2178_s10 = scalar_lea.vmem %s46_s8, 3072  ;;  %p2183_p11 = scmp.lt.s32.totalorder %s46_s8, %s46_s8 }
  0x1f   :  { %p2179_p10 = scmp.ne.s32.totalorder %s46_s8, %s2178_s10  ;;  %p2184_p12 = scmp.lt.s32.totalorder %s2178_s10, %s2178_s10 }
  0x21   :  { %p2185_p13 = por %p2184_p12, %p2183_p11 }
  0x23   :  { %p2186_p0 = pnand %p2185_p13, %p2179_p10 }
  0x25   :  { %2189 = shalt.err (!%p2186_p0)
}
  0x26   :  { %51 = dma.hbm_to_vmem [thread:$0]  %s2770_s2, 3072, %s46_s8, [#allocation7], %s2261_s21, %s2261_s21, %s2262_s22  }
  0x27   :  { %s2198_s0 = scalar_lea.vmem %s59_s1, 384  ;;  %p2203_p2 = scmp.lt.s32.totalorder %s59_s1, %s59_s1 }
  0x28   :  { %p2199_p1 = scmp.ne.s32.totalorder %s59_s1, %s2198_s0  ;;  %p2204_p3 = scmp.lt.s32.totalorder %s2198_s0, %s2198_s0 }
  0x2a   :  { %p2205_p4 = por %p2204_p3, %p2203_p2 }
  0x2c   :  { %p2206_p5 = pnand %p2205_p4, %p2199_p1 }
  0x2e   :  { %2209 = shalt.err (!%p2206_p5)
}
  0x2f   :  { %61 = dma.hbm_to_vmem [thread:$0]  %s2771_s3, 384, %s59_s1, [#allocation10]  }
  0x30   :  { %2250 = dma.done.wait [#allocation4], 512  }
  0x31   :  { %2251 = vsyncadd [#allocation4], 4294966784 }
  0x32   :  { %2252 = dma.done.wait [#allocation7], 6144  }
  0x33   :  { %2253 = vsyncadd [#allocation7], 4294961152 }
  0x34   :  { %2254 = dma.done.wait [#allocation10], 384  }
  0x35   :  { %2255 = vsyncadd [#allocation10], 4294966912  ;;  %v2775_v0 = vmov 0   ;;  %v1958_v1 = vld [vmem:[#allocation6 + $0xac] ss:$12 sps:$4 sm:$0xff]   ;;  %v1984_v12 = vld [vmem:[#allocation3] sm:$0xff]   ;;  %v2774_v55 = vlaneseq }
  0x36   :  { %321 = vmatprep.mubr.bf16.mxu0 %v2775_v0  ;;  %1957 = vset.pattern.permute.xlu0 %v2775_v0  ;;  %v1960_v2 = vld [vmem:[#allocation6 + $0xa8] ss:$12 sps:$4 sm:$0xff]   ;;  %v1963_v4 = vld [vmem:[#allocation6 + $0x90] ss:$12 sps:$4 sm:$0xff]   ;;  %v1966_v6 = vld [vmem:[#allocation6 + $0x78] ss:$12 sps:$4 sm:$0xff]  }
  0x37   :  { %289 = vmatprep.subr.bf16.mxu0 %v1958_v1  ;;  %v1961_v3 = vld [vmem:[#allocation6 + $0x94] ss:$12 sps:$4 sm:$0xff]   ;;  %v1964_v5 = vld [vmem:[#allocation6 + $0x7c] ss:$12 sps:$4 sm:$0xff]   ;;  %v1967_v7 = vld [vmem:[#allocation6 + $0x64] ss:$12 sps:$4 sm:$0xff]   ;;  %1776 = vmatprep.mubr.bf16.mxu1 %v1984_v12 }
  0x38   :  { %290 = vmatpush1.bf16.msra.mxu0 %v1960_v2  ;;  %v1979_v8 = vld [vmem:[#allocation6 + $0xb0] ss:$12 sps:$4 sm:$0xff]   ;;  %v1969_v9 = vld [vmem:[#allocation6 + $0x60] ss:$12 sps:$4 sm:$0xff]   ;;  %v1983_v11 = vld [vmem:[#allocation6 + $0x98] ss:$12 sps:$4 sm:$0xff]  }
  0x39   :  { %291 = vmatprep.subr.bf16.mxu0 %v1961_v3  ;;  %v1970_v10 = vld [vmem:[#allocation6 + $0x4c] ss:$12 sps:$4 sm:$0xff]   ;;  %1760 = vmatprep.subr.bf16.mxu1 %v1979_v8  ;;  %v1972_v13 = vld [vmem:[#allocation6 + $0x48] ss:$12 sps:$4 sm:$0xff]   ;;  %v1975_v17 = vld [vmem:[#allocation6 + $0x30] ss:$12 sps:$4 sm:$0xff]  }
  0x3a   :  { %1761 = vmatpush3.bf16.msra.mxu1 %v1979_v8  ;;  %v1988_v14 = vld [vmem:[#allocation6 + $0x80] ss:$12 sps:$4 sm:$0xff]   ;;  %v1992_v16 = vld [vmem:[#allocation6 + $0x68] ss:$12 sps:$4 sm:$0xff]   ;;  %v1997_v19 = vld [vmem:[#allocation6 + $0x50] ss:$12 sps:$4 sm:$0xff]  }
  0x3b   :  { %1762 = vmatprep.subr.bf16.mxu1 %v1983_v11  ;;  %v1973_v15 = vld [vmem:[#allocation6 + $0x34] ss:$12 sps:$4 sm:$0xff]   ;;  %v1976_v18 = vld [vmem:[#allocation6 + $0x1c] ss:$12 sps:$4 sm:$0xff]   ;;  %v1978_v20 = vld [vmem:[#allocation6 + $0x18] ss:$12 sps:$4 sm:$0xff]  }
  0x3c   :  { %292 = vmatpush1.bf16.msra.mxu0 %v1963_v4  ;;  %v1980_v21 = vld [vmem:[#allocation6 + $0x4] ss:$12 sps:$4 sm:$0xff]   ;;  %v1982_v23 = vld [vmem:[#allocation6] ss:$12 sps:$4 sm:$0xff]   ;;  %v2326_v26 = vld [vmem:[#allocation8 + $0xa8] ss:$12 sps:$4 sm:$0xff]  }
  0x3d   :  { %293 = vmatprep.subr.bf16.mxu0 %v1964_v5  ;;  %v2001_v22 = vld [vmem:[#allocation6 + $0x38] ss:$12 sps:$4 sm:$0xff]   ;;  %v2006_v25 = vld [vmem:[#allocation6 + $0x20] ss:$12 sps:$4 sm:$0xff]   ;;  %v2010_v28 = vld [vmem:[#allocation6 + $0x8] ss:$12 sps:$4 sm:$0xff]  }
  0x3e   :  { %1763 = vmatpush3.bf16.msra.mxu1 %v1983_v11  ;;  %v2324_v24 = vld [vmem:[#allocation8 + $0xac] ss:$12 sps:$4 sm:$0xff]   ;;  %v2329_v27 = vld [vmem:[#allocation8 + $0x94] ss:$12 sps:$4 sm:$0xff]   ;;  %v2332_v29 = vld [vmem:[#allocation8 + $0x90] ss:$12 sps:$4 sm:$0xff]  }
  0x3f   :  { %1764 = vmatprep.subr.bf16.mxu1 %v1988_v14  ;;  %v2336_v30 = vld [vmem:[#allocation8 + $0x7c] ss:$12 sps:$4 sm:$0xff]   ;;  %v2339_v32 = vld [vmem:[#allocation8 + $0x78] ss:$12 sps:$4 sm:$0xff]   ;;  %v2777_v35 = vmov 0.0   ;;  %v2002_v37 = vld [vmem:[#allocation3 + $0x10] sm:$0xff]  }
  0x40   :  { %294 = vmatpush1.bf16.msra.mxu0 %v1966_v6  ;;  %v1993_v31 = vld [vmem:[#allocation3 + $0x8] sm:$0xff]   ;;  %v2342_v33 = vld [vmem:[#allocation8 + $0x64] ss:$12 sps:$4 sm:$0xff]   ;;  %v2362_v41 = vld [vmem:[#allocation8 + $0x34] ss:$12 sps:$4 sm:$0xff]   ;;  %vm2270_vm0 = vmmov 0  }
  0x41   :  { %295 = vmatprep.subr.bf16.mxu0 %v1967_v7  ;;  %v2344_v34 = vld [vmem:[#allocation8 + $0xb0] ss:$12 sps:$4 sm:$0xff]   ;;  %v2348_v36 = vld [vmem:[#allocation8 + $0x60] ss:$12 sps:$4 sm:$0xff]   ;;  %v2355_v39 = vld [vmem:[#allocation8 + $0x98] ss:$12 sps:$4 sm:$0xff]  }
  0x42   :  { %1765 = vmatpush3.bf16.msra.mxu1 %v1988_v14  ;;  %v2352_v38 = vld [vmem:[#allocation8 + $0x4c] ss:$12 sps:$4 sm:$0xff]   ;;  %v2359_v40 = vld [vmem:[#allocation8 + $0x48] ss:$12 sps:$4 sm:$0xff]   ;;  %v2369_v44 = vld [vmem:[#allocation8 + $0x30] ss:$12 sps:$4 sm:$0xff]  }
  0x43   :  { %1766 = vmatprep.subr.bf16.mxu1 %v1992_v16  ;;  %v2365_v42 = vld [vmem:[#allocation8 + $0x80] ss:$12 sps:$4 sm:$0xff]   ;;  %v2011_v43 = vld [vmem:[#allocation3 + $0x18] sm:$0xff]   ;;  %v2376_v46 = vld [vmem:[#allocation8 + $0x68] ss:$12 sps:$4 sm:$0xff]   ;;  %v2271_v53 = vmov 0.0|0.0  }
  0x44   :  { %296 = vmatpush1.bf16.msra.mxu0 %v1969_v9  ;;  %v2373_v45 = vld [vmem:[#allocation8 + $0x1c] ss:$12 sps:$4 sm:$0xff]   ;;  %v2382_v47 = vld [vmem:[#allocation8 + $0x18] ss:$12 sps:$4 sm:$0xff]   ;;  %v2392_v50 = vld [vmem:[#allocation8] ss:$12 sps:$4 sm:$0xff]  }
  0x45   :  { %297 = vmatprep.subr.bf16.mxu0 %v1970_v10  ;;  %v2385_v48 = vld [vmem:[#allocation8 + $0x4] ss:$12 sps:$4 sm:$0xff]   ;;  %v2403_v52 = vld [vmem:[#allocation8 + $0x20] ss:$12 sps:$4 sm:$0xff]   ;;  %v2410_v54 = vld [vmem:[#allocation8 + $0x8] ss:$12 sps:$4 sm:$0xff]  }
  0x46   :  { %1767 = vmatpush3.bf16.msra.mxu1 %v1992_v16  ;;  %v2388_v49 = vld [vmem:[#allocation8 + $0x50] ss:$12 sps:$4 sm:$0xff]   ;;  %v2397_v51 = vld [vmem:[#allocation8 + $0x38] ss:$12 sps:$4 sm:$0xff]   ;;  %v123_v56 = vshrl.u32 %v2774_v55, 7  ;;  %s2272_s2 = smov [#allocation11]  }
  0x47   :  { %1768 = vmatprep.subr.bf16.mxu1 %v1997_v19  ;;  %v120_v58 = vld [vmem:[#allocation9] ss:$8 sm:$0x7]  ;;  %s1576_s3 = sshll.u32 %s2272_s2, 4  ;;  %s1577_s3 = int_to_ptr.vmem [resolvable:$true] %s1576_s3 }
  0x48   :  { %298 = vmatpush1.bf16.msra.mxu0 %v1972_v13  ;;  %v124_v57 = vsub.s32 0, %v123_v56  ;;  %v128_v60 = vsub.s32 1, %v123_v56  ;;  %v132_v63 = vsub.s32 2, %v123_v56  ;;  %s2210_s15 = scalar_lea.vmem %s1577_s3, 128  ;;  %p2215_p7 = scmp.lt.s32.totalorder %s1577_s3, %s1577_s3 }
  0x49   :  { %299 = vmatprep.subr.bf16.mxu0 %v1973_v15  ;;  %p2211_p6 = scmp.ne.s32.totalorder %s1577_s3, %s2210_s15  ;;  %p2216_p8 = scmp.lt.s32.totalorder %s2210_s15, %s2210_s15 }
  0x4a   :  { %1769 = vmatpush3.bf16.msra.mxu1 %v1997_v19  ;;  %v125_v62 = vrot.slane %v120_v58, %v124_v57  ;;  %v129_v2 = vrot.slane %v120_v58, %v128_v60  ;;  %v2452_v6 = vrot.slane %v120_v58, %v132_v63 }
  0x4b   :  { %1770 = vmatprep.subr.bf16.mxu1 %v2001_v22  ;;  %p2217_p9 = por %p2216_p8, %p2215_p7 }
  0x4c   :  { %300 = vmatpush1.bf16.msra.mxu0 %v1975_v17 }
  0x4d   :  { %301 = vmatprep.subr.bf16.mxu0 %v1976_v18  ;;  %p2218_p10 = pnand %p2217_p9, %p2211_p6 }
  0x4e   :  { %1771 = vmatpush3.bf16.msra.mxu1 %v2001_v22 }
  0x4f   :  { %1772 = vmatprep.subr.bf16.mxu1 %v2006_v25 }
  0x50   :  { %302 = vmatpush1.bf16.msra.mxu0 %v1978_v20 }
  0x51   :  { %303 = vmatprep.subr.bf16.mxu0 %v1980_v21 }
  0x52   :  { %1773 = vmatpush3.bf16.msra.mxu1 %v2006_v25 }
  0x53   :  { %1774 = vmatprep.subr.bf16.mxu1 %v2010_v28 }
  0x54   :  { %304 = vmatpush1.bf16.msra.mxu0 %v1982_v23 }
  0x55   :  { %623 = vmatprep.subr.bf16.mxu0 %v2324_v24 }
  0x56   :  { %1775 = vmatpush3.bf16.msra.mxu1 %v2010_v28 }
  0x57   :  { %322 = vmatmul.mubr.bf16.vlgmr.msra.gmra.mxu0 %v1984_v12  ;;  %1784 = vmatprep.subr.bf16.mxu1 %v2777_v35 }
  0x58   :  { %624 = vmatpush1.bf16.msra.mxu0 %v2326_v26  ;;  %331 = vmatprep.mubr.bf16.mxu0 %v2775_v0 }
  0x59   :  { %625 = vmatprep.subr.bf16.mxu0 %v2329_v27  ;;  %1777 = vmatmul.mubr.bf16.vlgmr.msra.gmra.mxu1 %v1993_v31 }
  0x5a   :  { %1785 = vmatpush3.bf16.msra.mxu1 %v2344_v34  ;;  %1780 = vmatprep.mubr.bf16.mxu1 %v2002_v37 }
  0x5b   :  { %1786 = vmatprep.subr.bf16.mxu1 %v2777_v35 }
  0x5c   :  { %626 = vmatpush1.bf16.msra.mxu0 %v2332_v29 }
  0x5d   :  { %627 = vmatprep.subr.bf16.mxu0 %v2336_v30 }
  0x5e   :  { %1787 = vmatpush3.bf16.msra.mxu1 %v2355_v39 }
  0x5f   :  { %332 = vmatmul.mubr.bf16.gmra.mxu0 %v1993_v31  ;;  %1788 = vmatprep.subr.bf16.mxu1 %v2777_v35 }
  0x60   :  { %628 = vmatpush1.bf16.msra.mxu0 %v2339_v32  ;;  %341 = vmatprep.mubr.bf16.mxu0 %v2775_v0 }
  0x61   :  { %629 = vmatprep.subr.bf16.mxu0 %v2342_v33  ;;  %1781 = vmatmul.mubr.bf16.gmra.mxu1 %v2011_v43 }
  0x62   :  { %1789 = vmatpush3.bf16.msra.mxu1 %v2365_v42  ;;  %1800 = vmatprep.mubr.msk.bf16.mxu1 %vm2270_vm0, %v2777_v35 }
  0x63   :  { %1790 = vmatprep.subr.bf16.mxu1 %v2777_v35 }
  0x64   :  { %630 = vmatpush1.bf16.msra.mxu0 %v2348_v36 }
  0x65   :  { %631 = vmatprep.subr.bf16.mxu0 %v2352_v38 }
  0x66   :  { %1791 = vmatpush3.bf16.msra.mxu1 %v2376_v46 }
  0x67   :  { %342 = vmatmul.mubr.bf16.gmra.mxu0 %v2002_v37  ;;  %1792 = vmatprep.subr.bf16.mxu1 %v2777_v35 }
  0x68   :  { %632 = vmatpush1.bf16.msra.mxu0 %v2359_v40  ;;  %351 = vmatprep.mubr.bf16.mxu0 %v2775_v0 }
  0x69   :  { %633 = vmatprep.subr.bf16.mxu0 %v2362_v41 }
  0x6a   :  { %1793 = vmatpush3.bf16.msra.mxu1 %v2388_v49 }
  0x6b   :  { %1794 = vmatprep.subr.bf16.mxu1 %v2777_v35 }
  0x6c   :  { %634 = vmatpush1.bf16.msra.mxu0 %v2369_v44 }
  0x6d   :  { %635 = vmatprep.subr.bf16.mxu0 %v2373_v45 }
  0x6e   :  { %1795 = vmatpush3.bf16.msra.mxu1 %v2397_v51 }
  0x6f   :  { %352 = vmatmul.mubr.bf16.gmra.mxu0 %v2011_v43  ;;  %1796 = vmatprep.subr.bf16.mxu1 %v2777_v35 }
  0x70   :  { %636 = vmatpush1.bf16.msra.mxu0 %v2382_v47  ;;  %655 = vmatprep.mubr.bf16.mxu0 %v2775_v0 }
  0x71   :  { %637 = vmatprep.subr.bf16.mxu0 %v2385_v48 }
  0x72   :  { %1797 = vmatpush3.bf16.msra.mxu1 %v2403_v52 }
  0x73   :  { %1798 = vmatprep.subr.bf16.mxu1 %v2777_v35 }
  0x74   :  { %638 = vmatpush1.bf16.msra.mxu0 %v2392_v50 }
  0x75   :  { %741 = vmatprep.subr.bf16.mxu0 %v2324_v24 }
  0x76   :  { %1799 = vmatpush3.bf16.msra.mxu1 %v2410_v54 }
  0x77   :  { %656 = vmatmul.mubr.bf16.vlgmr.msra.gmra.mxu0 %v2271_v53  ;;  %1804 = vmatprep.subr.bf16.mxu1 %v2777_v35 }
  0x78   :  { %742 = vmatpush1.bf16.msra.mxu0 %v2326_v26  ;;  %773 = vmatprep.mubr.bf16.mxu0 %v2775_v0 }
  0x79   :  { %743 = vmatprep.subr.bf16.mxu0 %v2329_v27  ;;  %1801 = vmatmul.mubr.bf16.vlgmr.msra.gmra.mxu1 %v2271_v53 }
  0x7a   :  { %1805 = vmatpush3.bf16.msra.mxu1 %v2344_v34  ;;  %1820 = vmatprep.mubr.msk.bf16.mxu1 %vm2270_vm0, %v2777_v35 }
  0x7b   :  { %1806 = vmatprep.subr.bf16.mxu1 %v2777_v35 }
  0x7c   :  { %744 = vmatpush1.bf16.msra.mxu0 %v2332_v29 }
  0x7d   :  { %745 = vmatprep.subr.bf16.mxu0 %v2336_v30 }
  0x7e   :  { %1807 = vmatpush3.bf16.msra.mxu1 %v2355_v39 }
  0x7f   :  { %1808 = vmatprep.subr.bf16.mxu1 %v2777_v35 }
  0x80   :  { %746 = vmatpush1.bf16.msra.mxu0 %v2339_v32 }
  0x81   :  { %747 = vmatprep.subr.bf16.mxu0 %v2342_v33 }
  0x82   :  { %1809 = vmatpush3.bf16.msra.mxu1 %v2365_v42 }
  0x83   :  { %1810 = vmatprep.subr.bf16.mxu1 %v2777_v35 }
  0x84   :  { %748 = vmatpush1.bf16.msra.mxu0 %v2348_v36 }
  0x85   :  { %749 = vmatprep.subr.bf16.mxu0 %v2352_v38 }
  0x86   :  { %1811 = vmatpush3.bf16.msra.mxu1 %v2376_v46 }
  0x87   :  { %1812 = vmatprep.subr.bf16.mxu1 %v2777_v35 }
  0x88   :  { %750 = vmatpush1.bf16.msra.mxu0 %v2359_v40 }
  0x89   :  { %751 = vmatprep.subr.bf16.mxu0 %v2362_v41 }
  0x8a   :  { %1813 = vmatpush3.bf16.msra.mxu1 %v2388_v49 }
  0x8b   :  { %1814 = vmatprep.subr.bf16.mxu1 %v2777_v35 }
  0x8c   :  { %752 = vmatpush1.bf16.msra.mxu0 %v2369_v44 }
  0x8d   :  { %753 = vmatprep.subr.bf16.mxu0 %v2373_v45 }
  0x8e   :  { %1815 = vmatpush3.bf16.msra.mxu1 %v2397_v51 }
  0x8f   :  { %1816 = vmatprep.subr.bf16.mxu1 %v2777_v35 }
  0x90   :  { %754 = vmatpush1.bf16.msra.mxu0 %v2382_v47 }
  0x91   :  { %755 = vmatprep.subr.bf16.mxu0 %v2385_v48 }
  0x92   :  { %1817 = vmatpush3.bf16.msra.mxu1 %v2403_v52 }
  0x93   :  { %1818 = vmatprep.subr.bf16.mxu1 %v2777_v35 }
  0x94   :  { %756 = vmatpush1.bf16.msra.mxu0 %v2392_v50 }
  0x95   :  { %859 = vmatprep.subr.bf16.mxu0 %v2324_v24 }
  0x96   :  { %1819 = vmatpush3.bf16.msra.mxu1 %v2410_v54 }
  0x97   :  { %1824 = vmatprep.subr.bf16.mxu1 %v2777_v35 }
 0x117   :  { %v323_v59 = vpop.f32.mrf.mxu0 }
 0x119   :  { %v325_v61 = vpop.f32.mrf.mxu0  ;;  %v1778_v10 = vpop.f32.mrf.mxu1 }
 0x11a   :  { %v2459_v12 = vadd.f32 %v1778_v10, %v2452_v6 }
 0x11b   :  { %v327_v1 = vpop.f32.mrf.mxu0  ;;  %v396_v14 = vpop.f32.mrf.mxu1 }
 0x11c   :  { %v2448_v3 = vadd.f32 %v327_v1, %v125_v62 }
 0x11d   :  { %v329_v4 = vpop.f32.mrf.mxu0  ;;  %v1779_v17 = vpop.f32.mrf.mxu1 }
 0x11e   :  { %v2450_v5 = vadd.f32 %v329_v4, %v129_v2  ;;  %v2466_v19 = vadd.f32 %v1779_v17, %v2452_v6 }
 0x11f   :  { %v333_v7 = vpop.f32.mrf.mxu0  ;;  %v399_v21 = vpop.f32.mrf.mxu1 }
 0x120   :  { %v2454_v8 = vadd.f32 %v333_v7, %v125_v62  ;;  %v2471_v23 = vadd.f32 %v399_v21, %v2452_v6 }
 0x121   :  { %v335_v9 = vpop.f32.mrf.mxu0  ;;  %v1782_v28 = vpop.f32.mrf.mxu1 }
 0x122   :  { %v2456_v11 = vadd.f32 %v335_v9, %v129_v2  ;;  %v2476_v37 = vadd.f32 %v1782_v28, %v2452_v6 }
 0x123   :  { %v337_v13 = vpop.f32.mrf.mxu0  ;;  %v412_v53 = vpop.f32.mrf.mxu1 }
 0x124   :  { %v2461_v15 = vadd.f32 %v337_v13, %v125_v62  ;;  %2779 = vst [vmem:[#allocation19_spill] sm:$0xff] %v2476_v37  ;;  %v2481_v57 = vadd.f32 %v412_v53, %v2452_v6 }
 0x125   :  { %v339_v16 = vpop.f32.mrf.mxu0  ;;  %v1783_v60 = vpop.f32.mrf.mxu1 }
 0x126   :  { %v2463_v18 = vadd.f32 %v339_v16, %v129_v2  ;;  %v2486_v1 = vadd.f32 %v1783_v60, %v2452_v6 }
 0x127   :  { %v343_v20 = vpop.f32.mrf.mxu0  ;;  %v415_v7 = vpop.f32.mrf.mxu1 }
 0x128   :  { %v2468_v22 = vadd.f32 %v343_v20, %v125_v62  ;;  %2780 = vst [vmem:[#allocation20_spill] sm:$0xff] %v2486_v1  ;;  %v2491_v10 = vadd.f32 %v415_v7, %v2452_v6 }
 0x129   :  { %v345_v25 = vpop.f32.mrf.mxu0 }
 0x12a   :  { %v2473_v31 = vadd.f32 %v345_v25, %v129_v2  ;;  %v324_v25 = vadd.f32 %v323_v59, %v125_v62 }
 0x12b   :  { %v347_v43 = vpop.f32.mrf.mxu0 }
 0x12c   :  { %v2478_v56 = vadd.f32 %v347_v43, %v125_v62 }
 0x12d   :  { %v349_v58 = vpop.f32.mrf.mxu0 }
 0x12e   :  { %v2483_v63 = vadd.f32 %v349_v58, %v129_v2 }
 0x12f   :  { %v353_v4 = vpop.f32.mrf.mxu0 }
 0x130   :  { %v2488_v9 = vadd.f32 %v353_v4, %v125_v62  ;;  %v326_v4 = vadd.f32 %v325_v61, %v129_v2  ;;  %v397_v61 = vadd.f32 %v396_v14, %v2452_v6  ;;  %v2783_v6 = vmov 0.0  }
 0x131   :  { %v355_v13 = vpop.f32.mrf.mxu0  ;;  %v2784_v14 = vmov 0  }
 0x132   :  { %v2493_v16 = vadd.f32 %v355_v13, %v129_v2 }
 0x133   :  { %v357_v17 = vpop.f32.mrf.mxu0 }
 0x134   :  { %2781 = vst [vmem:[#allocation21_spill] sm:$0xff] %v2493_v16  ;;  %v2495_v20 = vadd.f32 %v357_v17, %v125_v62  ;;  %v2499_v62 = vld [vmem:[#allocation9 + $0x1] ss:$0 sm:$0xff] }
 0x135   :  { %v359_v21 = vpop.f32.mrf.mxu0 }
 0x136   :  { %2782 = vst [vmem:[#allocation22_spill] sm:$0xff] %v2495_v20  ;;  %v2497_v28 = vadd.f32 %v359_v21, %v129_v2 }
 0x137   :  { %v657_v43 = vpop.f32.mrf.mxu0 }
 0x138   :  { %v704_v53 = vadd.f32 %v657_v43, %v324_v25 }
 0x139   :  { %v659_v58 = vpop.f32.mrf.mxu0  ;;  %v698_v35 = vpop.f32.mrf.mxu1 }
 0x13a   :  { %v1660_v60 = vmul.f32 -1.442695, %v704_v53  ;;  %v711_v7 = vadd.f32 %v659_v58, %v326_v4  ;;  %v718_v25 = vadd.f32 %v698_v35, %v2499_v62 }
 0x13b   :  { %v661_v55 = vpop.f32.mrf.mxu0  ;;  %v1802_v13 = vpop.f32.mrf.mxu1 }
 0x13c   :  { %2026 = vpow2.f32 %v1660_v60  ;;  %v1661_v1 = vmul.f32 -1.442695, %v711_v7 }
 0x13d   :  { %v662_v0 = vpop.f32.mrf.mxu0  ;;  %v701_v37 = vpop.f32.mrf.mxu1 }
 0x13e   :  { %2028 = vpow2.f32 %v1661_v1 }
 0x13f   :  { %v1803_v17 = vpop.f32.mrf.mxu1 }
 0x149   :  { %v2027_v20 = vpop.eup %2026 }
 0x14a   :  { %v708_v16 = vadd.f32 1.0, %v2027_v20  ;;  %v2503_v20 = vld [vmem:[#allocation9 + $0x2] ss:$0 sm:$0xff] }
 0x14b   :  { %v2029_v59 = vpop.eup %2028 }
 0x14c   :  { %2030 = vrcp.f32 %v708_v16  ;;  %v715_v21 = vadd.f32 1.0, %v2029_v59 }
 0x14e   :  { %2032 = vrcp.f32 %v715_v21 }
 0x159   :  { %v2031_v55 = vpop.eup %2030 }
 0x15a   :  { %v719_v0 = vmul.f32 %v2031_v55, %v718_v25 }
 0x15b   :  { %v2033_v43 = vpop.eup %2032 }
 0x15c   :  { %v720_v2 = vadd.f32 %v719_v0, %v397_v61  ;;  %v722_v37 = vsub.f32 1.0, %v2033_v43  ;;  %v724_v58 = vmul.f32 0.0, %v2033_v43 }
 0x15e   :  { %2034 = vtanh.f32 %v720_v2 }
 0x16b   :  { %v2035_v1 = vpop.eup %2034 }
 0x16c   :  { %v723_v53 = vmul.f32 %v2035_v1, %v722_v37 }
 0x16e   :  { %v2505_v16 = vadd.f32 %v724_v58, %v723_v53 }
 0x170   :  { %v740_v60 = vpack.c.bf16 %v2505_v16, %v2505_v16  ;;  %v726_v35 = vmul.f32 %v2505_v16, %v2503_v20 }
 0x172   :  { %774 = vmatmul.mubr.bf16.vlgmr.msra.gmra.mxu0 %v740_v60  ;;  %1821 = vmatmul.mubr.bf16.vlgmr.msra.gmra.mxu1 %v740_v60 }
 0x173   :  { %727 = vadd.xlane.f32.xlu0 %v726_v35  ;;  %860 = vmatpush1.bf16.msra.mxu0 %v2326_v26 }
 0x174   :  { %1825 = vmatpush3.bf16.msra.mxu1 %v2344_v34  ;;  %861 = vmatprep.subr.bf16.mxu0 %v2329_v27 }
 0x175   :  { %1826 = vmatprep.subr.bf16.mxu1 %v2783_v6  ;;  %891 = vmatprep.mubr.bf16.mxu0 %v2784_v14 }
 0x176   :  { %1840 = vmatprep.mubr.msk.bf16.mxu1 %vm2270_vm0, %v2783_v6 }
 0x177   :  { %862 = vmatpush1.bf16.msra.mxu0 %v2332_v29 }
 0x178   :  { %1827 = vmatpush3.bf16.msra.mxu1 %v2355_v39  ;;  %863 = vmatprep.subr.bf16.mxu0 %v2336_v30 }
 0x179   :  { %1828 = vmatprep.subr.bf16.mxu1 %v2783_v6 }
 0x17b   :  { %864 = vmatpush1.bf16.msra.mxu0 %v2339_v32 }
 0x17c   :  { %1829 = vmatpush3.bf16.msra.mxu1 %v2365_v42  ;;  %865 = vmatprep.subr.bf16.mxu0 %v2342_v33 }
 0x17d   :  { %1830 = vmatprep.subr.bf16.mxu1 %v2783_v6 }
 0x17f   :  { %866 = vmatpush1.bf16.msra.mxu0 %v2348_v36 }
 0x180   :  { %1831 = vmatpush3.bf16.msra.mxu1 %v2376_v46  ;;  %867 = vmatprep.subr.bf16.mxu0 %v2352_v38 }
 0x181   :  { %1832 = vmatprep.subr.bf16.mxu1 %v2783_v6 }
 0x183   :  { %868 = vmatpush1.bf16.msra.mxu0 %v2359_v40 }
 0x184   :  { %1833 = vmatpush3.bf16.msra.mxu1 %v2388_v49  ;;  %869 = vmatprep.subr.bf16.mxu0 %v2362_v41 }
 0x185   :  { %1834 = vmatprep.subr.bf16.mxu1 %v2783_v6 }
 0x187   :  { %870 = vmatpush1.bf16.msra.mxu0 %v2369_v44 }
 0x188   :  { %1835 = vmatpush3.bf16.msra.mxu1 %v2397_v51  ;;  %871 = vmatprep.subr.bf16.mxu0 %v2373_v45 }
 0x189   :  { %1836 = vmatprep.subr.bf16.mxu1 %v2783_v6 }
 0x18b   :  { %872 = vmatpush1.bf16.msra.mxu0 %v2382_v47 }
 0x18c   :  { %1837 = vmatpush3.bf16.msra.mxu1 %v2403_v52  ;;  %873 = vmatprep.subr.bf16.mxu0 %v2385_v48 }
 0x18d   :  { %1838 = vmatprep.subr.bf16.mxu1 %v2783_v6 }
 0x18f   :  { %874 = vmatpush1.bf16.msra.mxu0 %v2392_v50 }
 0x190   :  { %1839 = vmatpush3.bf16.msra.mxu1 %v2410_v54  ;;  %977 = vmatprep.subr.bf16.mxu0 %v2324_v24 }
 0x191   :  { %1844 = vmatprep.subr.bf16.mxu1 %v2783_v6 }
 0x232   :  { %v775_v4 = vpop.f32.mrf.mxu0  ;;  %v816_v7 = vpop.f32.mrf.mxu1 }
 0x233   :  { %v822_v13 = vadd.f32 %v775_v4, %v2448_v3  ;;  %v836_v60 = vadd.f32 %v816_v7, %v2499_v62 }
 0x234   :  { %v777_v17 = vpop.f32.mrf.mxu0  ;;  %v1822_v59 = vpop.f32.mrf.mxu1 }
 0x235   :  { %v1662_v21 = vmul.f32 -1.442695, %v822_v13  ;;  %v829_v2 = vadd.f32 %v777_v17, %v2450_v5 }
 0x236   :  { %v779_v25 = vpop.f32.mrf.mxu0  ;;  %v819_v55 = vpop.f32.mrf.mxu1 }
 0x237   :  { %2036 = vpow2.f32 %v1662_v21  ;;  %v1663_v43 = vmul.f32 -1.442695, %v829_v2 }
 0x238   :  { %v780_v61 = vpop.f32.mrf.mxu0  ;;  %v1823_v0 = vpop.f32.mrf.mxu1 }
 0x239   :  { %2038 = vpow2.f32 %v1663_v43 }
 0x244   :  { %v2037_v37 = vpop.eup %2036 }
 0x245   :  { %v826_v1 = vadd.f32 1.0, %v2037_v37 }
 0x246   :  { %v2039_v53 = vpop.eup %2038 }
 0x247   :  { %2040 = vrcp.f32 %v826_v1  ;;  %v833_v58 = vadd.f32 1.0, %v2039_v53 }
 0x249   :  { %2042 = vrcp.f32 %v833_v58 }
 0x254   :  { %v2041_v3 = vpop.eup %2040 }
 0x255   :  { %v837_v35 = vmul.f32 %v2041_v3, %v836_v60 }
 0x256   :  { %v2043_v13 = vpop.eup %2042 }
 0x257   :  { %v838_v4 = vadd.f32 %v837_v35, %v2471_v23  ;;  %v840_v59 = vsub.f32 1.0, %v2043_v13  ;;  %v842_v5 = vmul.f32 %v2043_v13, %v2505_v16 }
 0x259   :  { %2044 = vtanh.f32 %v838_v4 }
 0x266   :  { %v2045_v21 = vpop.eup %2044 }
 0x267   :  { %v841_v25 = vmul.f32 %v2045_v21, %v840_v59 }
 0x269   :  { %v2551_v17 = vadd.f32 %v842_v5, %v841_v25 }
 0x26b   :  { %v858_v55 = vpack.c.bf16 %v2551_v17, %v2551_v17  ;;  %v844_v7 = vmul.f32 %v2551_v17, %v2503_v20 }
 0x26d   :  { %892 = vmatmul.mubr.bf16.vlgmr.msra.gmra.mxu0 %v858_v55  ;;  %1841 = vmatmul.mubr.bf16.vlgmr.msra.gmra.mxu1 %v858_v55 }
 0x26e   :  { %845 = vadd.xlane.f32.xlu0 %v844_v7  ;;  %978 = vmatpush1.bf16.msra.mxu0 %v2326_v26 }
 0x26f   :  { %1845 = vmatpush3.bf16.msra.mxu1 %v2344_v34  ;;  %979 = vmatprep.subr.bf16.mxu0 %v2329_v27 }
 0x270   :  { %1846 = vmatprep.subr.bf16.mxu1 %v2783_v6  ;;  %1009 = vmatprep.mubr.bf16.mxu0 %v2784_v14 }
 0x271   :  { %1860 = vmatprep.mubr.msk.bf16.mxu1 %vm2270_vm0, %v2783_v6 }
 0x272   :  { %980 = vmatpush1.bf16.msra.mxu0 %v2332_v29 }
 0x273   :  { %1847 = vmatpush3.bf16.msra.mxu1 %v2355_v39  ;;  %981 = vmatprep.subr.bf16.mxu0 %v2336_v30 }
 0x274   :  { %1848 = vmatprep.subr.bf16.mxu1 %v2783_v6 }
 0x276   :  { %982 = vmatpush1.bf16.msra.mxu0 %v2339_v32 }
 0x277   :  { %1849 = vmatpush3.bf16.msra.mxu1 %v2365_v42  ;;  %983 = vmatprep.subr.bf16.mxu0 %v2342_v33 }
 0x278   :  { %1850 = vmatprep.subr.bf16.mxu1 %v2783_v6 }
 0x27a   :  { %984 = vmatpush1.bf16.msra.mxu0 %v2348_v36 }
 0x27b   :  { %1851 = vmatpush3.bf16.msra.mxu1 %v2376_v46  ;;  %985 = vmatprep.subr.bf16.mxu0 %v2352_v38 }
 0x27c   :  { %1852 = vmatprep.subr.bf16.mxu1 %v2783_v6 }
 0x27e   :  { %986 = vmatpush1.bf16.msra.mxu0 %v2359_v40 }
 0x27f   :  { %1853 = vmatpush3.bf16.msra.mxu1 %v2388_v49  ;;  %987 = vmatprep.subr.bf16.mxu0 %v2362_v41 }
 0x280   :  { %1854 = vmatprep.subr.bf16.mxu1 %v2783_v6 }
 0x282   :  { %988 = vmatpush1.bf16.msra.mxu0 %v2369_v44 }
 0x283   :  { %1855 = vmatpush3.bf16.msra.mxu1 %v2397_v51  ;;  %989 = vmatprep.subr.bf16.mxu0 %v2373_v45 }
 0x284   :  { %1856 = vmatprep.subr.bf16.mxu1 %v2783_v6 }
 0x286   :  { %990 = vmatpush1.bf16.msra.mxu0 %v2382_v47 }
 0x287   :  { %1857 = vmatpush3.bf16.msra.mxu1 %v2403_v52  ;;  %991 = vmatprep.subr.bf16.mxu0 %v2385_v48 }
 0x288   :  { %1858 = vmatprep.subr.bf16.mxu1 %v2783_v6 }
 0x28a   :  { %992 = vmatpush1.bf16.msra.mxu0 %v2392_v50 }
 0x28b   :  { %1859 = vmatpush3.bf16.msra.mxu1 %v2410_v54  ;;  %1095 = vmatprep.subr.bf16.mxu0 %v2324_v24 }
 0x28c   :  { %1864 = vmatprep.subr.bf16.mxu1 %v2783_v6 }
 0x32d   :  { %v893_v23 = vpop.f32.mrf.mxu0  ;;  %v934_v16 = vpop.f32.mrf.mxu1 }
 0x32e   :  { %v940_v61 = vadd.f32 %v893_v23, %v2454_v8  ;;  %v954_v21 = vadd.f32 %v934_v16, %v2499_v62 }
 0x32f   :  { %v895_v0 = vpop.f32.mrf.mxu0  ;;  %v1842_v2 = vpop.f32.mrf.mxu1 }
 0x330   :  { %v1664_v43 = vmul.f32 -1.442695, %v940_v61  ;;  %v947_v60 = vadd.f32 %v895_v0, %v2456_v11 }
 0x331   :  { %v897_v37 = vpop.f32.mrf.mxu0  ;;  %v937_v1 = vpop.f32.mrf.mxu1 }
 0x332   :  { %2046 = vpow2.f32 %v1664_v43  ;;  %v1665_v3 = vmul.f32 -1.442695, %v947_v60 }
 0x333   :  { %v898_v53 = vpop.f32.mrf.mxu0  ;;  %v1843_v58 = vpop.f32.mrf.mxu1 }
 0x334   :  { %2048 = vpow2.f32 %v1665_v3 }
 0x33f   :  { %v2047_v35 = vpop.eup %2046 }
 0x340   :  { %v944_v4 = vadd.f32 1.0, %v2047_v35 }
 0x341   :  { %v2049_v13 = vpop.eup %2048 }
 0x342   :  { %2050 = vrcp.f32 %v944_v4  ;;  %v951_v59 = vadd.f32 1.0, %v2049_v13 }
 0x344   :  { %2052 = vrcp.f32 %v951_v59 }
 0x34f   :  { %v2051_v8 = vpop.eup %2050 }
 0x350   :  { %v955_v25 = vmul.f32 %v2051_v8, %v954_v21 }
 0x351   :  { %v2053_v55 = vpop.eup %2052 }
 0x352   :  { %v956_v5 = vadd.f32 %v955_v25, %v2459_v12  ;;  %v958_v7 = vsub.f32 1.0, %v2053_v55  ;;  %v960_v11 = vmul.f32 %v2053_v55, %v2551_v17 }
 0x354   :  { %2054 = vtanh.f32 %v956_v5 }
 0x361   :  { %v2055_v23 = vpop.eup %2054 }
 0x362   :  { %v959_v61 = vmul.f32 %v2055_v23, %v958_v7 }
 0x364   :  { %v2597_v0 = vadd.f32 %v960_v11, %v959_v61 }
 0x366   :  { %v976_v2 = vpack.c.bf16 %v2597_v0, %v2597_v0  ;;  %v962_v16 = vmul.f32 %v2597_v0, %v2503_v20 }
 0x368   :  { %1010 = vmatmul.mubr.bf16.vlgmr.msra.gmra.mxu0 %v976_v2  ;;  %1861 = vmatmul.mubr.bf16.vlgmr.msra.gmra.mxu1 %v976_v2 }
 0x369   :  { %963 = vadd.xlane.f32.xlu1 %v962_v16  ;;  %1096 = vmatpush1.bf16.msra.mxu0 %v2326_v26 }
 0x36a   :  { %1865 = vmatpush3.bf16.msra.mxu1 %v2344_v34  ;;  %1097 = vmatprep.subr.bf16.mxu0 %v2329_v27 }
 0x36b   :  { %1866 = vmatprep.subr.bf16.mxu1 %v2783_v6  ;;  %1127 = vmatprep.mubr.bf16.mxu0 %v2784_v14 }
 0x36c   :  { %1880 = vmatprep.mubr.msk.bf16.mxu1 %vm2270_vm0, %v2783_v6 }
 0x36d   :  { %1098 = vmatpush1.bf16.msra.mxu0 %v2332_v29 }
 0x36e   :  { %1867 = vmatpush3.bf16.msra.mxu1 %v2355_v39  ;;  %1099 = vmatprep.subr.bf16.mxu0 %v2336_v30 }
 0x36f   :  { %1868 = vmatprep.subr.bf16.mxu1 %v2783_v6 }
 0x371   :  { %1100 = vmatpush1.bf16.msra.mxu0 %v2339_v32 }
 0x372   :  { %1869 = vmatpush3.bf16.msra.mxu1 %v2365_v42  ;;  %1101 = vmatprep.subr.bf16.mxu0 %v2342_v33 }
 0x373   :  { %1870 = vmatprep.subr.bf16.mxu1 %v2783_v6 }
 0x375   :  { %1102 = vmatpush1.bf16.msra.mxu0 %v2348_v36 }
 0x376   :  { %1871 = vmatpush3.bf16.msra.mxu1 %v2376_v46  ;;  %1103 = vmatprep.subr.bf16.mxu0 %v2352_v38 }
 0x377   :  { %1872 = vmatprep.subr.bf16.mxu1 %v2783_v6 }
 0x379   :  { %1104 = vmatpush1.bf16.msra.mxu0 %v2359_v40 }
 0x37a   :  { %1873 = vmatpush3.bf16.msra.mxu1 %v2388_v49  ;;  %1105 = vmatprep.subr.bf16.mxu0 %v2362_v41 }
 0x37b   :  { %1874 = vmatprep.subr.bf16.mxu1 %v2783_v6 }
 0x37d   :  { %1106 = vmatpush1.bf16.msra.mxu0 %v2369_v44 }
 0x37e   :  { %1875 = vmatpush3.bf16.msra.mxu1 %v2397_v51  ;;  %1107 = vmatprep.subr.bf16.mxu0 %v2373_v45 }
 0x37f   :  { %1876 = vmatprep.subr.bf16.mxu1 %v2783_v6 }
 0x381   :  { %1108 = vmatpush1.bf16.msra.mxu0 %v2382_v47 }
 0x382   :  { %1877 = vmatpush3.bf16.msra.mxu1 %v2403_v52  ;;  %1109 = vmatprep.subr.bf16.mxu0 %v2385_v48 }
 0x383   :  { %1878 = vmatprep.subr.bf16.mxu1 %v2783_v6 }
 0x385   :  { %1110 = vmatpush1.bf16.msra.mxu0 %v2392_v50 }
 0x386   :  { %1879 = vmatpush3.bf16.msra.mxu1 %v2410_v54  ;;  %1213 = vmatprep.subr.bf16.mxu0 %v2324_v24 }
 0x387   :  { %1884 = vmatprep.subr.bf16.mxu1 %v2783_v6 }
 0x428   :  { %v1011_v12 = vpop.f32.mrf.mxu0  ;;  %v1052_v17 = vpop.f32.mrf.mxu1 }
 0x429   :  { %v1058_v43 = vadd.f32 %v1011_v12, %v2461_v15  ;;  %v1072_v5 = vadd.f32 %v1052_v17, %v2499_v62 }
 0x42a   :  { %v1013_v37 = vpop.f32.mrf.mxu0  ;;  %v1862_v1 = vpop.f32.mrf.mxu1 }
 0x42b   :  { %v1666_v53 = vmul.f32 -1.442695, %v1058_v43  ;;  %v1065_v4 = vadd.f32 %v1013_v37, %v2463_v18 }
 0x42c   :  { %v1015_v58 = vpop.f32.mrf.mxu0  ;;  %v1055_v60 = vpop.f32.mrf.mxu1 }
 0x42d   :  { %2056 = vpow2.f32 %v1666_v53  ;;  %v1667_v13 = vmul.f32 -1.442695, %v1065_v4 }
 0x42e   :  { %v1016_v3 = vpop.f32.mrf.mxu0  ;;  %v1863_v35 = vpop.f32.mrf.mxu1 }
 0x42f   :  { %2058 = vpow2.f32 %v1667_v13 }
 0x43a   :  { %v2057_v59 = vpop.eup %2056 }
 0x43b   :  { %v1062_v21 = vadd.f32 1.0, %v2057_v59 }
 0x43c   :  { %v2059_v8 = vpop.eup %2058 }
 0x43d   :  { %2060 = vrcp.f32 %v1062_v21  ;;  %v1069_v25 = vadd.f32 1.0, %v2059_v8 }
 0x43f   :  { %2062 = vrcp.f32 %v1069_v25 }
 0x44a   :  { %v2061_v15 = vpop.eup %2060 }
 0x44b   :  { %v1073_v55 = vmul.f32 %v2061_v15, %v1072_v5 }
 0x44c   :  { %v2063_v23 = vpop.eup %2062 }
 0x44d   :  { %v1074_v7 = vadd.f32 %v1073_v55, %v2466_v19  ;;  %v1076_v61 = vsub.f32 1.0, %v2063_v23  ;;  %v1078_v18 = vmul.f32 %v2063_v23, %v2597_v0 }
 0x44f   :  { %2064 = vtanh.f32 %v1074_v7 }
 0x45c   :  { %v2065_v11 = vpop.eup %2064 }
 0x45d   :  { %v1077_v2 = vmul.f32 %v2065_v11, %v1076_v61 }
 0x45f   :  { %v2643_v16 = vadd.f32 %v1078_v18, %v1077_v2 }
 0x461   :  { %v1094_v12 = vpack.c.bf16 %v2643_v16, %v2643_v16  ;;  %v1080_v17 = vmul.f32 %v2643_v16, %v2503_v20 }
 0x463   :  { %1128 = vmatmul.mubr.bf16.vlgmr.msra.gmra.mxu0 %v1094_v12  ;;  %1881 = vmatmul.mubr.bf16.vlgmr.msra.gmra.mxu1 %v1094_v12 }
 0x464   :  { %1081 = vadd.xlane.f32.xlu1 %v1080_v17  ;;  %1214 = vmatpush1.bf16.msra.mxu0 %v2326_v26 }
 0x465   :  { %1885 = vmatpush3.bf16.msra.mxu1 %v2344_v34  ;;  %1215 = vmatprep.subr.bf16.mxu0 %v2329_v27 }
 0x466   :  { %1886 = vmatprep.subr.bf16.mxu1 %v2783_v6  ;;  %1245 = vmatprep.mubr.bf16.mxu0 %v2784_v14 }
 0x467   :  { %1900 = vmatprep.mubr.msk.bf16.mxu1 %vm2270_vm0, %v2783_v6 }
 0x468   :  { %1216 = vmatpush1.bf16.msra.mxu0 %v2332_v29 }
 0x469   :  { %1887 = vmatpush3.bf16.msra.mxu1 %v2355_v39  ;;  %1217 = vmatprep.subr.bf16.mxu0 %v2336_v30 }
 0x46a   :  { %1888 = vmatprep.subr.bf16.mxu1 %v2783_v6 }
 0x46c   :  { %1218 = vmatpush1.bf16.msra.mxu0 %v2339_v32 }
 0x46d   :  { %1889 = vmatpush3.bf16.msra.mxu1 %v2365_v42  ;;  %1219 = vmatprep.subr.bf16.mxu0 %v2342_v33 }
 0x46e   :  { %1890 = vmatprep.subr.bf16.mxu1 %v2783_v6 }
 0x470   :  { %1220 = vmatpush1.bf16.msra.mxu0 %v2348_v36 }
 0x471   :  { %1891 = vmatpush3.bf16.msra.mxu1 %v2376_v46  ;;  %1221 = vmatprep.subr.bf16.mxu0 %v2352_v38 }
 0x472   :  { %1892 = vmatprep.subr.bf16.mxu1 %v2783_v6 }
 0x474   :  { %1222 = vmatpush1.bf16.msra.mxu0 %v2359_v40 }
 0x475   :  { %1893 = vmatpush3.bf16.msra.mxu1 %v2388_v49  ;;  %1223 = vmatprep.subr.bf16.mxu0 %v2362_v41 }
 0x476   :  { %1894 = vmatprep.subr.bf16.mxu1 %v2783_v6 }
 0x478   :  { %1224 = vmatpush1.bf16.msra.mxu0 %v2369_v44 }
 0x479   :  { %1895 = vmatpush3.bf16.msra.mxu1 %v2397_v51  ;;  %1225 = vmatprep.subr.bf16.mxu0 %v2373_v45 }
 0x47a   :  { %1896 = vmatprep.subr.bf16.mxu1 %v2783_v6 }
 0x47c   :  { %1226 = vmatpush1.bf16.msra.mxu0 %v2382_v47 }
 0x47d   :  { %1897 = vmatpush3.bf16.msra.mxu1 %v2403_v52  ;;  %1227 = vmatprep.subr.bf16.mxu0 %v2385_v48 }
 0x47e   :  { %1898 = vmatprep.subr.bf16.mxu1 %v2783_v6 }
 0x480   :  { %1228 = vmatpush1.bf16.msra.mxu0 %v2392_v50 }
 0x481   :  { %1899 = vmatpush3.bf16.msra.mxu1 %v2410_v54  ;;  %1331 = vmatprep.subr.bf16.mxu0 %v2324_v24 }
 0x482   :  { %1904 = vmatprep.subr.bf16.mxu1 %v2783_v6 }
 0x523   :  { %v1129_v19 = vpop.f32.mrf.mxu0  ;;  %v1170_v0 = vpop.f32.mrf.mxu1 }
 0x524   :  { %v1176_v43 = vadd.f32 %v1129_v19, %v2468_v22  ;;  %v1190_v25 = vadd.f32 %v1170_v0, %v2499_v62  ;;  %v2107_v19 = vld [vmem:[#allocation8 + $0xa8] ss:$12 sps:$4 sm:$0xff]  }
 0x525   :  { %v1131_v37 = vpop.f32.mrf.mxu0  ;;  %v1882_v1 = vpop.f32.mrf.mxu1  ;;  %v2109_v0 = vld [vmem:[#allocation8 + $0x94] ss:$12 sps:$4 sm:$0xff]  }
 0x526   :  { %v1668_v53 = vmul.f32 -1.442695, %v1176_v43  ;;  %v1183_v4 = vadd.f32 %v1131_v37, %v2473_v31  ;;  %v2110_v43 = vld [vmem:[#allocation8 + $0x90] ss:$12 sps:$4 sm:$0xff]   ;;  %v2111_v37 = vld [vmem:[#allocation8 + $0x98] ss:$12 sps:$4 sm:$0xff]  }
 0x527   :  { %v1133_v58 = vpop.f32.mrf.mxu0  ;;  %v1173_v60 = vpop.f32.mrf.mxu1  ;;  %v2112_v1 = vld [vmem:[#allocation8 + $0x7c] ss:$12 sps:$4 sm:$0xff]  }
 0x528   :  { %2066 = vpow2.f32 %v1668_v53  ;;  %v1669_v13 = vmul.f32 -1.442695, %v1183_v4  ;;  %v2113_v53 = vld [vmem:[#allocation8 + $0x78] ss:$12 sps:$4 sm:$0xff]   ;;  %v2114_v58 = vld [vmem:[#allocation8 + $0x80] ss:$12 sps:$4 sm:$0xff]  }
 0x529   :  { %v1134_v3 = vpop.f32.mrf.mxu0  ;;  %v1883_v35 = vpop.f32.mrf.mxu1  ;;  %v2115_v60 = vld [vmem:[#allocation8 + $0x64] ss:$12 sps:$4 sm:$0xff]   ;;  %v2119_v4 = vld [vmem:[#allocation8 + $0x48] ss:$12 sps:$4 sm:$0xff]  }
 0x52a   :  { %2068 = vpow2.f32 %v1669_v13  ;;  %v2117_v3 = vld [vmem:[#allocation8 + $0x68] ss:$12 sps:$4 sm:$0xff]   ;;  %v2118_v35 = vld [vmem:[#allocation8 + $0x4c] ss:$12 sps:$4 sm:$0xff]   ;;  %v2120_v13 = vld [vmem:[#allocation8 + $0x50] ss:$12 sps:$4 sm:$0xff]  }
 0x535   :  { %v2067_v59 = vpop.eup %2066 }
 0x536   :  { %v1180_v24 = vadd.f32 1.0, %v2067_v59  ;;  %v2121_v59 = vld [vmem:[#allocation8 + $0x34] ss:$12 sps:$4 sm:$0xff]  }
 0x537   :  { %v2069_v21 = vpop.eup %2068 }
 0x538   :  { %2070 = vrcp.f32 %v1180_v24  ;;  %v1187_v8 = vadd.f32 1.0, %v2069_v21  ;;  %v2122_v24 = vld [vmem:[#allocation8 + $0x30] ss:$12 sps:$4 sm:$0xff]   ;;  %v2123_v21 = vld [vmem:[#allocation8 + $0x38] ss:$12 sps:$4 sm:$0xff]  }
 0x53a   :  { %2072 = vrcp.f32 %v1187_v8  ;;  %v2124_v8 = vld [vmem:[#allocation8 + $0x1c] ss:$12 sps:$4 sm:$0xff]  }
 0x545   :  { %v2071_v22 = vpop.eup %2070 }
 0x546   :  { %v1191_v5 = vmul.f32 %v2071_v22, %v1190_v25  ;;  %v2125_v25 = vld [vmem:[#allocation8 + $0x18] ss:$12 sps:$4 sm:$0xff]   ;;  %v2126_v22 = vld [vmem:[#allocation8 + $0x20] ss:$12 sps:$4 sm:$0xff]  }
 0x547   :  { %v2073_v55 = vpop.eup %2072 }
 0x548   :  { %v1192_v15 = vadd.f32 %v1191_v5, %v2481_v57  ;;  %v1194_v7 = vsub.f32 1.0, %v2073_v55  ;;  %v1196_v31 = vmul.f32 %v2073_v55, %v2643_v16  ;;  %v2127_v5 = vld [vmem:[#allocation8 + $0x4] ss:$12 sps:$4 sm:$0xff]   ;;  %v2129_v55 = vld [vmem:[#allocation8 + $0x8] ss:$12 sps:$4 sm:$0xff]  }
 0x54a   :  { %2074 = vtanh.f32 %v1192_v15  ;;  %v2128_v15 = vld [vmem:[#allocation8] ss:$12 sps:$4 sm:$0xff]  }
 0x557   :  { %v2075_v23 = vpop.eup %2074 }
 0x558   :  { %v1195_v61 = vmul.f32 %v2075_v23, %v1194_v7 }
 0x55a   :  { %v2689_v11 = vadd.f32 %v1196_v31, %v1195_v61 }
 0x55c   :  { %v1212_v2 = vpack.c.bf16 %v2689_v11, %v2689_v11  ;;  %v1198_v18 = vmul.f32 %v2689_v11, %v2503_v20 }
 0x55e   :  { %1246 = vmatmul.mubr.bf16.vlgmr.msra.gmra.mxu0 %v1212_v2  ;;  %1901 = vmatmul.mubr.bf16.vlgmr.msra.gmra.mxu1 %v1212_v2 }
 0x55f   :  { %1199 = vadd.xlane.f32.xlu0 %v1198_v18  ;;  %1332 = vmatpush1.bf16.msra.mxu0 %v2326_v26  ;;  %v2106_v26 = vld [vmem:[#allocation8 + $0xac] ss:$12 sps:$4 sm:$0xff]  }
 0x560   :  { %1905 = vmatpush3.bf16.msra.mxu1 %v2344_v34  ;;  %1333 = vmatprep.subr.bf16.mxu0 %v2329_v27 }
 0x561   :  { %1906 = vmatprep.subr.bf16.mxu1 %v2783_v6  ;;  %1363 = vmatprep.mubr.bf16.mxu0 %v2784_v14 }
 0x562   :  { %1920 = vmatprep.mubr.msk.bf16.mxu1 %vm2270_vm0, %v2783_v6 }
 0x563   :  { %1334 = vmatpush1.bf16.msra.mxu0 %v2332_v29 }
 0x564   :  { %1907 = vmatpush3.bf16.msra.mxu1 %v2355_v39  ;;  %1335 = vmatprep.subr.bf16.mxu0 %v2336_v30 }
 0x565   :  { %1908 = vmatprep.subr.bf16.mxu1 %v2783_v6 }
 0x567   :  { %1336 = vmatpush1.bf16.msra.mxu0 %v2339_v32 }
 0x568   :  { %1909 = vmatpush3.bf16.msra.mxu1 %v2365_v42  ;;  %1337 = vmatprep.subr.bf16.mxu0 %v2342_v33 }
 0x569   :  { %1910 = vmatprep.subr.bf16.mxu1 %v2783_v6 }
 0x56b   :  { %1338 = vmatpush1.bf16.msra.mxu0 %v2348_v36 }
 0x56c   :  { %1911 = vmatpush3.bf16.msra.mxu1 %v2376_v46  ;;  %1339 = vmatprep.subr.bf16.mxu0 %v2352_v38 }
 0x56d   :  { %1912 = vmatprep.subr.bf16.mxu1 %v2783_v6 }
 0x56f   :  { %1340 = vmatpush1.bf16.msra.mxu0 %v2359_v40 }
 0x570   :  { %1913 = vmatpush3.bf16.msra.mxu1 %v2388_v49  ;;  %1341 = vmatprep.subr.bf16.mxu0 %v2362_v41 }
 0x571   :  { %1914 = vmatprep.subr.bf16.mxu1 %v2783_v6 }
 0x573   :  { %1342 = vmatpush1.bf16.msra.mxu0 %v2369_v44 }
 0x574   :  { %1915 = vmatpush3.bf16.msra.mxu1 %v2397_v51  ;;  %1343 = vmatprep.subr.bf16.mxu0 %v2373_v45 }
 0x575   :  { %1916 = vmatprep.subr.bf16.mxu1 %v2783_v6 }
 0x577   :  { %1344 = vmatpush1.bf16.msra.mxu0 %v2382_v47 }
 0x578   :  { %1917 = vmatpush3.bf16.msra.mxu1 %v2403_v52  ;;  %1345 = vmatprep.subr.bf16.mxu0 %v2385_v48 }
 0x579   :  { %1918 = vmatprep.subr.bf16.mxu1 %v2783_v6 }
 0x57b   :  { %1346 = vmatpush1.bf16.msra.mxu0 %v2392_v50 }
 0x57c   :  { %1919 = vmatpush3.bf16.msra.mxu1 %v2410_v54  ;;  %1449 = vmatprep.subr.bf16.mxu0 %v2106_v26 }
 0x57d   :  { %1924 = vmatprep.subr.bf16.mxu1 %v2783_v6 }
 0x61e   :  { %v1247_v27 = vpop.f32.mrf.mxu0  ;;  %v1288_v29 = vpop.f32.mrf.mxu1 }
 0x61f   :  { %v1294_v30 = vadd.f32 %v1247_v27, %v2478_v56  ;;  %v1308_v48 = vadd.f32 %v1288_v29, %v2499_v62 }
 0x620   :  { %v1249_v32 = vpop.f32.mrf.mxu0  ;;  %v1902_v33 = vpop.f32.mrf.mxu1 }
 0x621   :  { %v1670_v34 = vmul.f32 -1.442695, %v1294_v30  ;;  %v1301_v41 = vadd.f32 %v1249_v32, %v2483_v63  ;;  %v2785_v30 = vld [vmem:[#allocation21_spill] sm:$0xff] }
 0x622   :  { %v1251_v36 = vpop.f32.mrf.mxu0  ;;  %v1291_v38 = vpop.f32.mrf.mxu1 }
 0x623   :  { %2076 = vpow2.f32 %v1670_v34  ;;  %v1671_v42 = vmul.f32 -1.442695, %v1301_v41  ;;  %v2786_v41 = vld [vmem:[#allocation19_spill] sm:$0xff] }
 0x624   :  { %v1252_v39 = vpop.f32.mrf.mxu0  ;;  %v1903_v40 = vpop.f32.mrf.mxu1 }
 0x625   :  { %2078 = vpow2.f32 %v1671_v42 }
 0x630   :  { %v2077_v44 = vpop.eup %2076 }
 0x631   :  { %v1298_v45 = vadd.f32 1.0, %v2077_v44 }
 0x632   :  { %v2079_v46 = vpop.eup %2078 }
 0x633   :  { %2080 = vrcp.f32 %v1298_v45  ;;  %v1305_v47 = vadd.f32 1.0, %v2079_v46 }
 0x635   :  { %2082 = vrcp.f32 %v1305_v47 }
 0x640   :  { %v2081_v49 = vpop.eup %2080 }
 0x641   :  { %v1309_v50 = vmul.f32 %v2081_v49, %v1308_v48 }
 0x642   :  { %v2083_v52 = vpop.eup %2082 }
 0x643   :  { %v1310_v51 = vadd.f32 %v1309_v50, %v2491_v10  ;;  %v1312_v54 = vsub.f32 1.0, %v2083_v52  ;;  %v1314_v63 = vmul.f32 %v2083_v52, %v2689_v11  ;;  %v2108_v10 = vld [vmem:[#allocation8 + $0xb0] ss:$12 sps:$4 sm:$0xff]   ;;  %v1561_v52 = vld [vmem:[#allocation9 + $0x3] ss:$0 sm:$0xff] }
 0x645   :  { %2084 = vtanh.f32 %v1310_v51 }
 0x652   :  { %v2085_v56 = vpop.eup %2084 }
 0x653   :  { %v1313_v57 = vmul.f32 %v2085_v56, %v1312_v54 }
 0x655   :  { %v2734_v16 = vadd.f32 %v1314_v63, %v1313_v57  ;;  %v2787_v57 = vld [vmem:[#allocation22_spill] sm:$0xff] }
 0x657   :  { %v1330_v12 = vpack.c.bf16 %v2734_v16, %v2734_v16  ;;  %v1316_v17 = vmul.f32 %v2734_v16, %v2503_v20 }
 0x659   :  { %1364 = vmatmul.mubr.bf16.vlgmr.msra.gmra.mxu0 %v1330_v12  ;;  %1921 = vmatmul.mubr.bf16.vlgmr.msra.gmra.mxu1 %v1330_v12 }
 0x65a   :  { %1317 = vadd.xlane.f32.xlu1 %v1316_v17  ;;  %1450 = vmatpush1.bf16.msra.mxu0 %v2107_v19 }
 0x65b   :  { %1925 = vmatpush3.bf16.msra.mxu1 %v2108_v10  ;;  %1451 = vmatprep.subr.bf16.mxu0 %v2109_v0 }
 0x65c   :  { %1926 = vmatprep.subr.bf16.mxu1 %v2783_v6  ;;  %1481 = vmatprep.mubr.bf16.mxu0 %v2784_v14  ;;  %v2116_v14 = vld [vmem:[#allocation8 + $0x60] ss:$12 sps:$4 sm:$0xff]  }
 0x65d   :  { %1940 = vmatprep.mubr.msk.bf16.mxu1 %vm2270_vm0, %v2783_v6 }
 0x65e   :  { %1452 = vmatpush1.bf16.msra.mxu0 %v2110_v43 }
 0x65f   :  { %1927 = vmatpush3.bf16.msra.mxu1 %v2111_v37  ;;  %1453 = vmatprep.subr.bf16.mxu0 %v2112_v1 }
 0x660   :  { %1928 = vmatprep.subr.bf16.mxu1 %v2783_v6 }
 0x662   :  { %1454 = vmatpush1.bf16.msra.mxu0 %v2113_v53 }
 0x663   :  { %1929 = vmatpush3.bf16.msra.mxu1 %v2114_v58  ;;  %1455 = vmatprep.subr.bf16.mxu0 %v2115_v60 }
 0x664   :  { %1930 = vmatprep.subr.bf16.mxu1 %v2783_v6 }
 0x666   :  { %1456 = vmatpush1.bf16.msra.mxu0 %v2116_v14 }
 0x667   :  { %1931 = vmatpush3.bf16.msra.mxu1 %v2117_v3  ;;  %1457 = vmatprep.subr.bf16.mxu0 %v2118_v35 }
 0x668   :  { %1932 = vmatprep.subr.bf16.mxu1 %v2783_v6 }
 0x66a   :  { %1458 = vmatpush1.bf16.msra.mxu0 %v2119_v4 }
 0x66b   :  { %1933 = vmatpush3.bf16.msra.mxu1 %v2120_v13  ;;  %1459 = vmatprep.subr.bf16.mxu0 %v2121_v59  ;;  %v2788_v13 = vld [vmem:[#allocation20_spill] sm:$0xff] }
 0x66c   :  { %1934 = vmatprep.subr.bf16.mxu1 %v2783_v6 }
 0x66e   :  { %1460 = vmatpush1.bf16.msra.mxu0 %v2122_v24 }
 0x66f   :  { %1935 = vmatpush3.bf16.msra.mxu1 %v2123_v21  ;;  %1461 = vmatprep.subr.bf16.mxu0 %v2124_v8 }
 0x670   :  { %1936 = vmatprep.subr.bf16.mxu1 %v2783_v6 }
 0x672   :  { %1462 = vmatpush1.bf16.msra.mxu0 %v2125_v25 }
 0x673   :  { %1937 = vmatpush3.bf16.msra.mxu1 %v2126_v22  ;;  %1463 = vmatprep.subr.bf16.mxu0 %v2127_v5 }
 0x674   :  { %1938 = vmatprep.subr.bf16.mxu1 %v2783_v6 }
 0x676   :  { %1464 = vmatpush1.bf16.msra.mxu0 %v2128_v15 }
 0x677   :  { %1939 = vmatpush3.bf16.msra.mxu1 %v2129_v55 }
 0x719   :  { %v1365_v7 = vpop.f32.mrf.mxu0  ;;  %v1406_v23 = vpop.f32.mrf.mxu1 }
 0x71a   :  { %v1412_v61 = vadd.f32 %v1365_v7, %v2488_v9  ;;  %v1426_v39 = vadd.f32 %v1406_v23, %v2499_v62 }
 0x71b   :  { %v1367_v31 = vpop.f32.mrf.mxu0  ;;  %v1922_v11 = vpop.f32.mrf.mxu1 }
 0x71c   :  { %v1672_v2 = vmul.f32 -1.442695, %v1412_v61  ;;  %v1419_v32 = vadd.f32 %v1367_v31, %v2785_v30 }
 0x71d   :  { %v1369_v18 = vpop.f32.mrf.mxu0  ;;  %v1409_v26 = vpop.f32.mrf.mxu1 }
 0x71e   :  { %2086 = vpow2.f32 %v1672_v2  ;;  %v1673_v33 = vmul.f32 -1.442695, %v1419_v32 }
 0x71f   :  { %v1370_v27 = vpop.f32.mrf.mxu0  ;;  %v1923_v29 = vpop.f32.mrf.mxu1 }
 0x720   :  { %2088 = vpow2.f32 %v1673_v33 }
 0x72b   :  { %v2087_v6 = vpop.eup %2086 }
 0x72c   :  { %v1416_v34 = vadd.f32 1.0, %v2087_v6 }
 0x72d   :  { %v2089_v36 = vpop.eup %2088 }
 0x72e   :  { %2090 = vrcp.f32 %v1416_v34  ;;  %v1423_v38 = vadd.f32 1.0, %v2089_v36 }
 0x730   :  { %2092 = vrcp.f32 %v1423_v38 }
 0x73b   :  { %v2091_v9 = vpop.eup %2090 }
 0x73c   :  { %v1427_v40 = vmul.f32 %v2091_v9, %v1426_v39 }
 0x73d   :  { %v2093_v44 = vpop.eup %2092 }
 0x73e   :  { %v1428_v42 = vadd.f32 %v1427_v40, %v2786_v41  ;;  %v1430_v45 = vsub.f32 1.0, %v2093_v44  ;;  %v1432_v48 = vmul.f32 %v2093_v44, %v2734_v16 }
 0x740   :  { %2094 = vtanh.f32 %v1428_v42 }
 0x74d   :  { %v2095_v46 = vpop.eup %2094 }
 0x74e   :  { %v1431_v47 = vmul.f32 %v2095_v46, %v1430_v45 }
 0x750   :  { %v1433_v49 = vadd.f32 %v1432_v48, %v1431_v47 }
 0x752   :  { %v1448_v50 = vpack.c.bf16 %v1433_v49, %v1433_v49  ;;  %v1434_v51 = vmul.f32 %v1433_v49, %v2503_v20 }
 0x754   :  { %1482 = vmatmul.mubr.bf16.vlgmr.msra.gmra.mxu0 %v1448_v50  ;;  %1941 = vmatmul.mubr.bf16.vlgmr.msra.gmra.mxu1 %v1448_v50 }
 0x755   :  { %1435 = vadd.xlane.f32.xlu0 %v1434_v51 }
 0x76b   :  { %1564 = vperm.xlu0 %1957, %v1561_v52  }
 0x814   :  { %v1483_v54 = vpop.f32.mrf.mxu0  ;;  %v1524_v56 = vpop.f32.mrf.mxu1 }
 0x815   :  { %v1530_v63 = vadd.f32 %v1483_v54, %v2787_v57  ;;  %v1544_v3 = vadd.f32 %v1524_v56, %v2499_v62 }
 0x816   :  { %v1485_v12 = vpop.f32.mrf.mxu0  ;;  %v1942_v17 = vpop.f32.mrf.mxu1 }
 0x817   :  { %v1674_v19 = vmul.f32 -1.442695, %v1530_v63  ;;  %v1537_v37 = vadd.f32 %v1485_v12, %v2497_v28 }
 0x818   :  { %v1487_v10 = vpop.f32.mrf.mxu0  ;;  %v1527_v0 = vpop.f32.mrf.mxu1 }
 0x819   :  { %2096 = vpow2.f32 %v1674_v19  ;;  %v1675_v1 = vmul.f32 -1.442695, %v1537_v37 }
 0x81a   :  { %v1488_v16 = vpop.f32.mrf.mxu0  ;;  %v1943_v43 = vpop.f32.mrf.mxu1 }
 0x81b   :  { %2098 = vpow2.f32 %v1675_v1 }
 0x826   :  { %v2097_v53 = vpop.eup %2096 }
 0x827   :  { %v1534_v58 = vadd.f32 1.0, %v2097_v53 }
 0x828   :  { %v2099_v60 = vpop.eup %2098 }
 0x829   :  { %2100 = vrcp.f32 %v1534_v58  ;;  %v1541_v14 = vadd.f32 1.0, %v2099_v60 }
 0x82b   :  { %2102 = vrcp.f32 %v1541_v14 }
 0x836   :  { %v2101_v35 = vpop.eup %2100 }
 0x837   :  { %v1545_v4 = vmul.f32 %v2101_v35, %v1544_v3 }
 0x838   :  { %v2103_v24 = vpop.eup %2102 }
 0x839   :  { %v1546_v59 = vadd.f32 %v1545_v4, %v2788_v13  ;;  %v1548_v21 = vsub.f32 1.0, %v2103_v24  ;;  %v1550_v28 = vmul.f32 %v2103_v24, %v1433_v49 }
 0x83b   :  { %2104 = vtanh.f32 %v1546_v59 }
 0x848   :  { %v2105_v8 = vpop.eup %2104 }
 0x849   :  { %v1549_v25 = vmul.f32 %v2105_v8, %v1548_v21 }
 0x84b   :  { %v1551_v22 = vadd.f32 %v1550_v28, %v1549_v25 }
 0x84d   :  { %v1552_v5 = vmul.f32 %v1551_v22, %v2503_v20  ;;  %1560 = vst [vmem:[#allocation11] sm:$0xff] %v1551_v22 }
 0x84f   :  { %1553 = vadd.xlane.f32.xlu1 %v1552_v5 }
 0x850   :  { %2221 = shalt.err (!%p2218_p10)
}
 0x851   :  { %1579 = dma.vmem_to_hbm [thread:$0]  %s1577_s3, 128, %s2772_s4, [#allocation5]   ;;  %v728_v62 = vpop.xlane.xlu0 %727  ;;  %v2789_v15 = vlaneseq  ;;  %v964_v7 = vpop.xlane.xlu1 %963  ;;  %vm1568_vm9 = vcmask 64512  }
 0x852   :  { %s2273_s4 = smov [#allocation12]  }
 0x853   :  { %v486_v55 = vand.u32 127, %v2789_v15  ;;  %s1586_s18 = sshll.u32 %s2273_s4, 4  ;;  %s1587_s18 = int_to_ptr.vmem [resolvable:$true] %s1586_s18 }
 0x854   :  { %s2230_s19 = scalar_lea.vmem %s1587_s18, 128  ;;  %p2235_p12 = scmp.lt.s32.totalorder %s1587_s18, %s1587_s18 }
 0x855   :  { %vm847_vm1 = vcmp.eq.s32.totalorder %v486_v55, 1  ;;  %v846_v20 = vpop.xlane.xlu0 %845  ;;  %vm729_vm2 = vcmp.eq.s32.totalorder %v486_v55, 0  ;;  %vm965_vm3 = vcmp.eq.s32.totalorder %v486_v55, 2  ;;  %vm1083_vm4 = vcmp.eq.s32.totalorder %v486_v55, 3  ;;  %v1082_v61 = vpop.xlane.xlu1 %1081  ;;  %p2231_p11 = scmp.ne.s32.totalorder %s1587_s18, %s2230_s19  ;;  %p2236_p13 = scmp.lt.s32.totalorder %s2230_s19, %s2230_s19 }
 0x856   :  { %v850_v23 = vsel %vm847_vm1, %v846_v20, 0.0  ;;  %v732_v31 = vsel %vm729_vm2, %v728_v62, 0.0  ;;  %v968_v11 = vsel %vm965_vm3, %v964_v7, 0.0  ;;  %vm1201_vm5 = vcmp.eq.s32.totalorder %v486_v55, 4 }
 0x857   :  { %v851_v2 = vadd.f32 %v850_v23, %v732_v31  ;;  %v1086_v26 = vsel %vm1083_vm4, %v1082_v61, 0.0  ;;  %vm1319_vm6 = vcmp.eq.s32.totalorder %v486_v55, 5  ;;  %vm1437_vm7 = vcmp.eq.s32.totalorder %v486_v55, 6  ;;  %p2237_p0 = por %p2236_p13, %p2235_p12 }
 0x858   :  { %vm1555_vm8 = vcmp.eq.s32.totalorder %v486_v55, 7 }
 0x859   :  { %v1200_v18 = vpop.xlane.xlu0 %1199  ;;  %v969_v27 = vadd.f32 %v968_v11, %v851_v2  ;;  %v1318_v29 = vpop.xlane.xlu1 %1317  ;;  %p2238_p1 = pnand %p2237_p0, %p2231_p11 }
 0x85a   :  { %v1204_v30 = vsel %vm1201_vm5, %v1200_v18, 0.0  ;;  %v1322_v6 = vsel %vm1319_vm6, %v1318_v29, 0.0 }
 0x85b   :  { %v1087_v32 = vadd.f32 %v1086_v26, %v969_v27 }
 0x85d   :  { %v1436_v33 = vpop.xlane.xlu0 %1435  ;;  %v1205_v34 = vadd.f32 %v1204_v30, %v1087_v32 }
 0x85e   :  { %v1440_v36 = vsel %vm1437_vm7, %v1436_v33, 0.0 }
 0x85f   :  { %v1323_v38 = vadd.f32 %v1322_v6, %v1205_v34 }
 0x861   :  { %v1441_v39 = vadd.f32 %v1440_v36, %v1323_v38  ;;  %v1565_v41 = vpop.permute.xlu0 %1564 }
 0x8d8   :  { %v1554_v9 = vpop.xlane.xlu1 %1553 }
 0x8d9   :  { %v1558_v40 = vsel %vm1555_vm8, %v1554_v9, 0.0 }
 0x8da   :  { %v1559_v42 = vadd.f32 %v1558_v40, %v1441_v39 }
 0x8dc   :  { %v1567_v44 = vadd.f32 %v1565_v41, %v1559_v42 }
 0x8de   :  { %1569 = vst.msk [vmem:[#allocation12] sm:$0xff] %vm1568_vm9, %v1567_v44 }
 0x8df   :  { %2241 = shalt.err (!%p2238_p1)
}
 0x8e0   :  { %1589 = dma.vmem_to_hbm [thread:$0]  %s1587_s18, 128, %s2773_s5, [#allocation13]  }
 0x8e1   :  { %2256 = dma.done.wait [#allocation5], 128  }
 0x8e2   :  { %2257 = vsyncadd [#allocation5], 4294967168 }
 0x8e3   :  { %2258 = dma.done.wait [#allocation13], 128  }
 0x8e4   :  { %2259 = vsyncadd [#allocation13], 4294967168 }
 0x8e5   :  { %1596 = vsyncpa [#allocation4], 1 }
 0x8e6   :  { %1597 = vsyncpa [#allocation7], 1 }
 0x8e7   :  { %1598 = vsyncpa [#allocation10], 1 }
 0x8e8   :  { %1599 = vsyncpa [#allocation5], 1 }
 0x8e9   :  { %1600 = vsyncpa [#allocation13], 1 }

</bundles_post_ra>
